<compile_context>
chip_gen: v7x
topology: tpu7x:2x2x1
jax: 0.10.0
libtpu: 0.0.40
codegen_flags: <defaults>
</compile_context>

<pallas_src>
import functools

import jax
import jax.numpy as jnp
from jax import lax
from jax.experimental import pallas as pl
from jax.experimental.pallas import tpu as pltpu


def _roll_lanes(x, shift):
    """Static roll along the last (lane) axis; normalizes negative shifts."""
    return pltpu.roll(x, shift=shift % x.shape[-1], axis=x.ndim - 1)


def _conv3x3_chw(src_f32, w_ref, b_ref, masks, W, apply_relu):
    """3x3 'same' cross-correlation in channels-major layout.

    src_f32 : (Cin, H*W)        f32 value, spatial flattened into lanes
    w_ref   : (3, 3, Cout, Cin) bf16 ref; w_ref[dy, dx] == torch_w[:, :, dy, dx]
    b_ref   : (Cout, 1)         f32 ref
    masks   : (not_top, not_bottom, not_left, not_right), each (1, H*W) bool
    returns : (Cout, H*W)       f32 (bias added, optional ReLU)
    """
    not_top, not_bottom, not_left, not_right = masks

    # dy handled on the (narrow) input side: two lane-rolls by +-W + a row mask.
    up = jnp.where(not_top, _roll_lanes(src_f32, W), 0.0)      # in[h-1, w]
    down = jnp.where(not_bottom, _roll_lanes(src_f32, -W), 0.0)  # in[h+1, w]
    bands = (up.astype(jnp.bfloat16),
             src_f32.astype(jnp.bfloat16),
             down.astype(jnp.bfloat16))

    w_all = w_ref[...]                                          # (3, 3, Cout, Cin) bf16

    def dx_group(dx):
        # Three accumulating MXU dots (one per dy) -- no K-dim concat copies.
        s = jnp.dot(w_all[0, dx], bands[0], preferred_element_type=jnp.float32)
        s = s + jnp.dot(w_all[1, dx], bands[1], preferred_element_type=jnp.float32)
        s = s + jnp.dot(w_all[2, dx], bands[2], preferred_element_type=jnp.float32)
        return s                                                # (Cout, H*W) f32

    # dx handled on the output side: one roll + one narrow mask per shifted group.
    acc = dx_group(1)
    acc = acc + jnp.where(not_left, _roll_lanes(dx_group(0), 1), 0.0)
    acc = acc + jnp.where(not_right, _roll_lanes(dx_group(2), -1), 0.0)
    acc = acc + b_ref[...]
    if apply_relu:
        acc = jnp.maximum(acc, 0.0)
    return acc


def _flow_head_kernel(x_ref, w1_ref, b1_ref, w2_ref, b2_ref, o_ref, *, H, W):
    """One batch image: fused conv1 + ReLU + conv2; everything stays in VMEM."""
    P = H * W

    # Edge masks, built ONCE per kernel as narrow (1, P) predicates, reused by both convs.
    pos = lax.broadcasted_iota(jnp.int32, (1, P), 1)
    col = pos % W
    masks = (pos >= W,              # not_top     (h >= 1)
             pos < (H - 1) * W,     # not_bottom  (h <= H-2)
             col != 0,              # not_left    (w >= 1)
             col != W - 1)          # not_right   (w <= W-2)

    h = _conv3x3_chw(x_ref[0], w1_ref, b1_ref, masks, W, apply_relu=True)
    y = _conv3x3_chw(h, w2_ref, b2_ref, masks, W, apply_relu=False)
    o_ref[0] = y                    # (Cout, P) f32 -- lane-dense, already NCHW order


@jax.jit
def flow_head(x_nchw, w1_oihw, b1, w2_oihw, b2):
    """FlowHead.forward: conv2(relu(conv1(x))).  NCHW f32 in, NCHW f32 out."""
    B, cin, H, W = x_nchw.shape
    chid = w1_oihw.shape[0]
    cout = w2_oihw.shape[0]
    P = H * W

    x = x_nchw.reshape(B, cin, P)                                # free row-major reshape
    # (O, I, ky, kx) -> (ky, kx, O, I): w[dy, dx] is a ready (Cout, Cin) MXU tap.
    w1t = jnp.transpose(w1_oihw, (2, 3, 0, 1)).astype(jnp.bfloat16)
    w2t = jnp.transpose(w2_oihw, (2, 3, 0, 1)).astype(jnp.bfloat16)
    b1c = b1.reshape(chid, 1).astype(jnp.float32)
    b2c = b2.reshape(cout, 1).astype(jnp.float32)

    out = pl.pallas_call(
        functools.partial(_flow_head_kernel, H=H, W=W),
        out_shape=jax.ShapeDtypeStruct((B, cout, P), jnp.float32),
        grid=(B,),
        in_specs=[
            pl.BlockSpec((1, cin, P), lambda b: (b, 0, 0)),
            pl.BlockSpec((3, 3, chid, cin), lambda b: (0, 0, 0, 0)),
            pl.BlockSpec((chid, 1), lambda b: (0, 0)),
            pl.BlockSpec((3, 3, cout, chid), lambda b: (0, 0, 0, 0)),
            pl.BlockSpec((cout, 1), lambda b: (0, 0)),
        ],
        out_specs=pl.BlockSpec((1, cout, P), lambda b: (b, 0, 0)),
        compiler_params=pltpu.CompilerParams(
            dimension_semantics=("parallel",),
            vmem_limit_bytes=64 * 1024 * 1024),
    )(x, w1t, b1c, w2t, b2c)
    # TODO(synk): for very large H*W (and for B=1 on v7x's two TensorCores) add a
    # second "parallel" row-tile grid axis with a 1-row hidden-activation halo
    # (recompute two extra conv1 rows per tile) instead of whole-image blocks.
    return out.reshape(B, cout, H, W)                            # free reshape -> NCHW


def _reference_flow_head(x_nchw, w1, b1, w2, b2):
    """Pure-JAX reference with the same bf16-operand / f32-accumulate recipe."""
    dn = ("NCHW", "OIHW", "NCHW")
    h = lax.conv_general_dilated(x_nchw.astype(jnp.bfloat16), w1.astype(jnp.bfloat16),
                                 (1, 1), "SAME", dimension_numbers=dn,
                                 preferred_element_type=jnp.float32)
    h = jnp.maximum(h + b1[None, :, None, None], 0.0).astype(jnp.bfloat16)
    y = lax.conv_general_dilated(h, w2.astype(jnp.bfloat16), (1, 1), "SAME",
                                 dimension_numbers=dn,
                                 preferred_element_type=jnp.float32)
    return y + b2[None, :, None, None]


if __name__ == "__main__":
    # Small shapes consistent with FlowHead(input_dim, hidden_dim, output_dim=2).
    B, Cin, Chid, Cout, H, W = 2, 32, 64, 2, 16, 16

    key = jax.random.PRNGKey(0)
    k_x, k_w1, k_b1, k_w2, k_b2 = jax.random.split(key, 5)

    # Torch-layout (OIHW) conv weights.
    x = jax.random.normal(k_x, (B, Cin, H, W), jnp.float32)
    w1 = jax.random.normal(k_w1, (Chid, Cin, 3, 3), jnp.float32) * 0.05
    b1 = jax.random.normal(k_b1, (Chid,), jnp.float32) * 0.05
    w2 = jax.random.normal(k_w2, (Cout, Chid, 3, 3), jnp.float32) * 0.05
    b2 = jax.random.normal(k_b2, (Cout,), jnp.float32) * 0.05

    out = jax.block_until_ready(flow_head(x, w1, b1, w2, b2))
    ref = jax.block_until_ready(_reference_flow_head(x, w1, b1, w2, b2))

    assert out.shape == (B, Cout, H, W), out.shape
    max_err = float(jnp.max(jnp.abs(out - ref)))
    assert jnp.allclose(out, ref, atol=2e-2, rtol=2e-2), max_err
    print("KERNEL_OK")
</pallas_src>

<mosaic_0001>
module attributes {stable_mosaic.version = 11 : i64} {
  func.func @_flow_head_kernel(%arg0: i32, %arg1: memref<1x32x256xf32, #tpu.memory_space<vmem>>, %arg2: memref<3x3x64x32xbf16, #tpu.memory_space<vmem>>, %arg3: memref<64x1xf32, #tpu.memory_space<vmem>>, %arg4: memref<3x3x2x64xbf16, #tpu.memory_space<vmem>>, %arg5: memref<2x1xf32, #tpu.memory_space<vmem>>, %arg6: memref<1x2x256xf32, #tpu.memory_space<vmem>>) attributes {dimension_semantics = [#tpu.dimension_semantics<parallel>], iteration_bounds = array<i64: 2>, scalar_prefetch = 0 : i64, scratch_operands = 0 : i64, tpu.core_type = #tpu.core_type<tc>, window_params = [{transform_indices = @transform_0, window_bounds = array<i64: 1, 32, 256>}, {pipeline_mode = #tpu.pipeline_mode<synchronous>, transform_indices = @transform_1, window_bounds = array<i64: 3, 3, 64, 32>}, {pipeline_mode = #tpu.pipeline_mode<synchronous>, transform_indices = @transform_2, window_bounds = array<i64: 64, 1>}, {pipeline_mode = #tpu.pipeline_mode<synchronous>, transform_indices = @transform_3, window_bounds = array<i64: 3, 3, 2, 64>}, {pipeline_mode = #tpu.pipeline_mode<synchronous>, transform_indices = @transform_4, window_bounds = array<i64: 2, 1>}, {transform_indices = @transform_5, window_bounds = array<i64: 1, 2, 256>}]} {
    %0 = tpu.iota {dimensions = array<i32: 1>} : vector<1x256xi32>
    %c16_i32 = arith.constant 16 : i32
    %c0_i32 = arith.constant 0 : i32
    %1 = arith.cmpi eq, %c16_i32, %c0_i32 : i32
    %c1_i32 = arith.constant 1 : i32
    %2 = arith.select %1, %c1_i32, %c16_i32 : i32
    %3 = vector.broadcast %2 : i32 to vector<1x256xi32>
    %4 = arith.remsi %0, %3 : vector<1x256xi32>
    %c0_i32_0 = arith.constant 0 : i32
    %5 = vector.broadcast %c0_i32_0 : i32 to vector<1x256xi32>
    %6 = arith.cmpi ne, %4, %5 : vector<1x256xi32>
    %c0_i32_1 = arith.constant 0 : i32
    %7 = vector.broadcast %c0_i32_1 : i32 to vector<1x256xi32>
    %8 = arith.cmpi slt, %4, %7 : vector<1x256xi32>
    %c0_i32_2 = arith.constant 0 : i32
    %9 = arith.cmpi slt, %2, %c0_i32_2 : i32
    %10 = vector.broadcast %9 : i1 to vector<1x256xi1>
    %11 = vector.broadcast %10 : vector<1x256xi1> to vector<1x256xi1>
    %12 = arith.xori %8, %11 : vector<1x256xi1>
    %13 = arith.andi %12, %6 : vector<1x256xi1>
    %14 = vector.broadcast %2 : i32 to vector<1x256xi32>
    %15 = arith.addi %4, %14 : vector<1x256xi32>
    %16 = arith.select %13, %15, %4 : vector<1x256xi1>, vector<1x256xi32>
    %c16_i32_3 = arith.constant 16 : i32
    %17 = vector.broadcast %c16_i32_3 : i32 to vector<1x256xi32>
    %18 = arith.cmpi sge, %0, %17 : vector<1x256xi32>
    %c240_i32 = arith.constant 240 : i32
    %19 = vector.broadcast %c240_i32 : i32 to vector<1x256xi32>
    %20 = arith.cmpi slt, %0, %19 : vector<1x256xi32>
    %c0_i32_4 = arith.constant 0 : i32
    %21 = vector.broadcast %c0_i32_4 : i32 to vector<1x256xi32>
    %22 = arith.cmpi ne, %16, %21 : vector<1x256xi32>
    %c15_i32 = arith.constant 15 : i32
    %23 = vector.broadcast %c15_i32 : i32 to vector<1x256xi32>
    %24 = arith.cmpi ne, %16, %23 : vector<1x256xi32>
    %c0 = arith.constant 0 : index
    %c0_5 = arith.constant 0 : index
    %c0_6 = arith.constant 0 : index
    %25 = vector.load %arg1[%c0, %c0_5, %c0_6] : memref<1x32x256xf32, #tpu.memory_space<vmem>>, vector<1x32x256xf32>
    %26 = vector.shape_cast %25 : vector<1x32x256xf32> to vector<32x256xf32>
    %c16_i32_7 = arith.constant 16 : i32
    %27 = tpu.dynamic_rotate %26 by %c16_i32_7 dim 1 : vector<32x256xf32>, i32 -> vector<32x256xf32>
    %cst = arith.constant 0.000000e+00 : f32
    %28 = vector.shape_cast %18 : vector<1x256xi1> to vector<1x256xi1>
    %29 = vector.broadcast %28 : vector<1x256xi1> to vector<32x256xi1>
    %30 = vector.broadcast %cst : f32 to vector<32x256xf32>
    %31 = arith.select %29, %27, %30 : vector<32x256xi1>, vector<32x256xf32>
    %c240_i32_8 = arith.constant 240 : i32
    %32 = tpu.dynamic_rotate %26 by %c240_i32_8 dim 1 : vector<32x256xf32>, i32 -> vector<32x256xf32>
    %cst_9 = arith.constant 0.000000e+00 : f32
    %33 = vector.shape_cast %20 : vector<1x256xi1> to vector<1x256xi1>
    %34 = vector.broadcast %33 : vector<1x256xi1> to vector<32x256xi1>
    %35 = vector.broadcast %cst_9 : f32 to vector<32x256xf32>
    %36 = arith.select %34, %32, %35 : vector<32x256xi1>, vector<32x256xf32>
    %37 = arith.truncf %31 : vector<32x256xf32> to vector<32x256xbf16>
    %38 = arith.truncf %26 : vector<32x256xf32> to vector<32x256xbf16>
    %39 = arith.truncf %36 : vector<32x256xf32> to vector<32x256xbf16>
    %c0_10 = arith.constant 0 : index
    %c0_11 = arith.constant 0 : index
    %c0_12 = arith.constant 0 : index
    %c0_13 = arith.constant 0 : index
    %40 = vector.load %arg2[%c0_10, %c0_11, %c0_12, %c0_13] : memref<3x3x64x32xbf16, #tpu.memory_space<vmem>>, vector<3x3x64x32xbf16>
    %41 = vector.extract_strided_slice %40 {offsets = [0, 1, 0, 0], sizes = [1, 1, 64, 32], strides = [1, 1, 1, 1]} : vector<3x3x64x32xbf16> to vector<1x1x64x32xbf16>
    %42 = vector.shape_cast %41 : vector<1x1x64x32xbf16> to vector<64x32xbf16>
    %cst_14 = arith.constant dense<0.000000e+00> : vector<64x256xf32>
    %43 = tpu.matmul %42, %37, %cst_14 {dimension_numbers = #tpu.dot_dimension_numbers<[1], [0], [0], [1], [0, 0, 1, 1], [], []>} : vector<64x32xbf16>, vector<32x256xbf16>, vector<64x256xf32> -> vector<64x256xf32>
    %44 = vector.extract_strided_slice %40 {offsets = [1, 1, 0, 0], sizes = [1, 1, 64, 32], strides = [1, 1, 1, 1]} : vector<3x3x64x32xbf16> to vector<1x1x64x32xbf16>
    %45 = vector.shape_cast %44 : vector<1x1x64x32xbf16> to vector<64x32xbf16>
    %cst_15 = arith.constant dense<0.000000e+00> : vector<64x256xf32>
    %46 = tpu.matmul %45, %38, %cst_15 {dimension_numbers = #tpu.dot_dimension_numbers<[1], [0], [0], [1], [0, 0, 1, 1], [], []>} : vector<64x32xbf16>, vector<32x256xbf16>, vector<64x256xf32> -> vector<64x256xf32>
    %47 = arith.addf %43, %46 : vector<64x256xf32>
    %48 = vector.extract_strided_slice %40 {offsets = [2, 1, 0, 0], sizes = [1, 1, 64, 32], strides = [1, 1, 1, 1]} : vector<3x3x64x32xbf16> to vector<1x1x64x32xbf16>
    %49 = vector.shape_cast %48 : vector<1x1x64x32xbf16> to vector<64x32xbf16>
    %cst_16 = arith.constant dense<0.000000e+00> : vector<64x256xf32>
    %50 = tpu.matmul %49, %39, %cst_16 {dimension_numbers = #tpu.dot_dimension_numbers<[1], [0], [0], [1], [0, 0, 1, 1], [], []>} : vector<64x32xbf16>, vector<32x256xbf16>, vector<64x256xf32> -> vector<64x256xf32>
    %51 = arith.addf %47, %50 : vector<64x256xf32>
    %52 = vector.extract_strided_slice %40 {offsets = [0, 0, 0, 0], sizes = [1, 1, 64, 32], strides = [1, 1, 1, 1]} : vector<3x3x64x32xbf16> to vector<1x1x64x32xbf16>
    %53 = vector.shape_cast %52 : vector<1x1x64x32xbf16> to vector<64x32xbf16>
    %cst_17 = arith.constant dense<0.000000e+00> : vector<64x256xf32>
    %54 = tpu.matmul %53, %37, %cst_17 {dimension_numbers = #tpu.dot_dimension_numbers<[1], [0], [0], [1], [0, 0, 1, 1], [], []>} : vector<64x32xbf16>, vector<32x256xbf16>, vector<64x256xf32> -> vector<64x256xf32>
    %55 = vector.extract_strided_slice %40 {offsets = [1, 0, 0, 0], sizes = [1, 1, 64, 32], strides = [1, 1, 1, 1]} : vector<3x3x64x32xbf16> to vector<1x1x64x32xbf16>
    %56 = vector.shape_cast %55 : vector<1x1x64x32xbf16> to vector<64x32xbf16>
    %cst_18 = arith.constant dense<0.000000e+00> : vector<64x256xf32>
    %57 = tpu.matmul %56, %38, %cst_18 {dimension_numbers = #tpu.dot_dimension_numbers<[1], [0], [0], [1], [0, 0, 1, 1], [], []>} : vector<64x32xbf16>, vector<32x256xbf16>, vector<64x256xf32> -> vector<64x256xf32>
    %58 = arith.addf %54, %57 : vector<64x256xf32>
    %59 = vector.extract_strided_slice %40 {offsets = [2, 0, 0, 0], sizes = [1, 1, 64, 32], strides = [1, 1, 1, 1]} : vector<3x3x64x32xbf16> to vector<1x1x64x32xbf16>
    %60 = vector.shape_cast %59 : vector<1x1x64x32xbf16> to vector<64x32xbf16>
    %cst_19 = arith.constant dense<0.000000e+00> : vector<64x256xf32>
    %61 = tpu.matmul %60, %39, %cst_19 {dimension_numbers = #tpu.dot_dimension_numbers<[1], [0], [0], [1], [0, 0, 1, 1], [], []>} : vector<64x32xbf16>, vector<32x256xbf16>, vector<64x256xf32> -> vector<64x256xf32>
    %62 = arith.addf %58, %61 : vector<64x256xf32>
    %c1_i32_20 = arith.constant 1 : i32
    %63 = tpu.dynamic_rotate %62 by %c1_i32_20 dim 1 : vector<64x256xf32>, i32 -> vector<64x256xf32>
    %cst_21 = arith.constant 0.000000e+00 : f32
    %64 = vector.shape_cast %22 : vector<1x256xi1> to vector<1x256xi1>
    %65 = vector.broadcast %64 : vector<1x256xi1> to vector<64x256xi1>
    %66 = vector.broadcast %cst_21 : f32 to vector<64x256xf32>
    %67 = arith.select %65, %63, %66 : vector<64x256xi1>, vector<64x256xf32>
    %68 = arith.addf %51, %67 : vector<64x256xf32>
    %69 = vector.extract_strided_slice %40 {offsets = [0, 2, 0, 0], sizes = [1, 1, 64, 32], strides = [1, 1, 1, 1]} : vector<3x3x64x32xbf16> to vector<1x1x64x32xbf16>
    %70 = vector.shape_cast %69 : vector<1x1x64x32xbf16> to vector<64x32xbf16>
    %cst_22 = arith.constant dense<0.000000e+00> : vector<64x256xf32>
    %71 = tpu.matmul %70, %37, %cst_22 {dimension_numbers = #tpu.dot_dimension_numbers<[1], [0], [0], [1], [0, 0, 1, 1], [], []>} : vector<64x32xbf16>, vector<32x256xbf16>, vector<64x256xf32> -> vector<64x256xf32>
    %72 = vector.extract_strided_slice %40 {offsets = [1, 2, 0, 0], sizes = [1, 1, 64, 32], strides = [1, 1, 1, 1]} : vector<3x3x64x32xbf16> to vector<1x1x64x32xbf16>
    %73 = vector.shape_cast %72 : vector<1x1x64x32xbf16> to vector<64x32xbf16>
    %cst_23 = arith.constant dense<0.000000e+00> : vector<64x256xf32>
    %74 = tpu.matmul %73, %38, %cst_23 {dimension_numbers = #tpu.dot_dimension_numbers<[1], [0], [0], [1], [0, 0, 1, 1], [], []>} : vector<64x32xbf16>, vector<32x256xbf16>, vector<64x256xf32> -> vector<64x256xf32>
    %75 = arith.addf %71, %74 : vector<64x256xf32>
    %76 = vector.extract_strided_slice %40 {offsets = [2, 2, 0, 0], sizes = [1, 1, 64, 32], strides = [1, 1, 1, 1]} : vector<3x3x64x32xbf16> to vector<1x1x64x32xbf16>
    %77 = vector.shape_cast %76 : vector<1x1x64x32xbf16> to vector<64x32xbf16>
    %cst_24 = arith.constant dense<0.000000e+00> : vector<64x256xf32>
    %78 = tpu.matmul %77, %39, %cst_24 {dimension_numbers = #tpu.dot_dimension_numbers<[1], [0], [0], [1], [0, 0, 1, 1], [], []>} : vector<64x32xbf16>, vector<32x256xbf16>, vector<64x256xf32> -> vector<64x256xf32>
    %79 = arith.addf %75, %78 : vector<64x256xf32>
    %c255_i32 = arith.constant 255 : i32
    %80 = tpu.dynamic_rotate %79 by %c255_i32 dim 1 : vector<64x256xf32>, i32 -> vector<64x256xf32>
    %cst_25 = arith.constant 0.000000e+00 : f32
    %81 = vector.shape_cast %24 : vector<1x256xi1> to vector<1x256xi1>
    %82 = vector.broadcast %81 : vector<1x256xi1> to vector<64x256xi1>
    %83 = vector.broadcast %cst_25 : f32 to vector<64x256xf32>
    %84 = arith.select %82, %80, %83 : vector<64x256xi1>, vector<64x256xf32>
    %85 = arith.addf %68, %84 : vector<64x256xf32>
    %c0_26 = arith.constant 0 : index
    %c0_27 = arith.constant 0 : index
    %86 = vector.load %arg3[%c0_26, %c0_27] : memref<64x1xf32, #tpu.memory_space<vmem>>, vector<64x1xf32>
    %87 = vector.broadcast %86 : vector<64x1xf32> to vector<64x256xf32>
    %88 = arith.addf %85, %87 : vector<64x256xf32>
    %cst_28 = arith.constant 0.000000e+00 : f32
    %89 = vector.broadcast %cst_28 : f32 to vector<64x256xf32>
    %90 = arith.maximumf %88, %89 : vector<64x256xf32>
    %c16_i32_29 = arith.constant 16 : i32
    %91 = tpu.dynamic_rotate %90 by %c16_i32_29 dim 1 : vector<64x256xf32>, i32 -> vector<64x256xf32>
    %cst_30 = arith.constant 0.000000e+00 : f32
    %92 = vector.shape_cast %18 : vector<1x256xi1> to vector<1x256xi1>
    %93 = vector.broadcast %92 : vector<1x256xi1> to vector<64x256xi1>
    %94 = vector.broadcast %cst_30 : f32 to vector<64x256xf32>
    %95 = arith.select %93, %91, %94 : vector<64x256xi1>, vector<64x256xf32>
    %c240_i32_31 = arith.constant 240 : i32
    %96 = tpu.dynamic_rotate %90 by %c240_i32_31 dim 1 : vector<64x256xf32>, i32 -> vector<64x256xf32>
    %cst_32 = arith.constant 0.000000e+00 : f32
    %97 = vector.shape_cast %20 : vector<1x256xi1> to vector<1x256xi1>
    %98 = vector.broadcast %97 : vector<1x256xi1> to vector<64x256xi1>
    %99 = vector.broadcast %cst_32 : f32 to vector<64x256xf32>
    %100 = arith.select %98, %96, %99 : vector<64x256xi1>, vector<64x256xf32>
    %101 = arith.truncf %95 : vector<64x256xf32> to vector<64x256xbf16>
    %102 = arith.truncf %90 : vector<64x256xf32> to vector<64x256xbf16>
    %103 = arith.truncf %100 : vector<64x256xf32> to vector<64x256xbf16>
    %c0_33 = arith.constant 0 : index
    %c0_34 = arith.constant 0 : index
    %c0_35 = arith.constant 0 : index
    %c0_36 = arith.constant 0 : index
    %104 = vector.load %arg4[%c0_33, %c0_34, %c0_35, %c0_36] : memref<3x3x2x64xbf16, #tpu.memory_space<vmem>>, vector<3x3x2x64xbf16>
    %105 = vector.extract_strided_slice %104 {offsets = [0, 1, 0, 0], sizes = [1, 1, 2, 64], strides = [1, 1, 1, 1]} : vector<3x3x2x64xbf16> to vector<1x1x2x64xbf16>
    %106 = vector.shape_cast %105 : vector<1x1x2x64xbf16> to vector<2x64xbf16>
    %cst_37 = arith.constant dense<0.000000e+00> : vector<2x256xf32>
    %107 = tpu.matmul %106, %101, %cst_37 {dimension_numbers = #tpu.dot_dimension_numbers<[1], [0], [0], [1], [0, 0, 1, 1], [], []>} : vector<2x64xbf16>, vector<64x256xbf16>, vector<2x256xf32> -> vector<2x256xf32>
    %108 = vector.extract_strided_slice %104 {offsets = [1, 1, 0, 0], sizes = [1, 1, 2, 64], strides = [1, 1, 1, 1]} : vector<3x3x2x64xbf16> to vector<1x1x2x64xbf16>
    %109 = vector.shape_cast %108 : vector<1x1x2x64xbf16> to vector<2x64xbf16>
    %cst_38 = arith.constant dense<0.000000e+00> : vector<2x256xf32>
    %110 = tpu.matmul %109, %102, %cst_38 {dimension_numbers = #tpu.dot_dimension_numbers<[1], [0], [0], [1], [0, 0, 1, 1], [], []>} : vector<2x64xbf16>, vector<64x256xbf16>, vector<2x256xf32> -> vector<2x256xf32>
    %111 = arith.addf %107, %110 : vector<2x256xf32>
    %112 = vector.extract_strided_slice %104 {offsets = [2, 1, 0, 0], sizes = [1, 1, 2, 64], strides = [1, 1, 1, 1]} : vector<3x3x2x64xbf16> to vector<1x1x2x64xbf16>
    %113 = vector.shape_cast %112 : vector<1x1x2x64xbf16> to vector<2x64xbf16>
    %cst_39 = arith.constant dense<0.000000e+00> : vector<2x256xf32>
    %114 = tpu.matmul %113, %103, %cst_39 {dimension_numbers = #tpu.dot_dimension_numbers<[1], [0], [0], [1], [0, 0, 1, 1], [], []>} : vector<2x64xbf16>, vector<64x256xbf16>, vector<2x256xf32> -> vector<2x256xf32>
    %115 = arith.addf %111, %114 : vector<2x256xf32>
    %116 = vector.extract_strided_slice %104 {offsets = [0, 0, 0, 0], sizes = [1, 1, 2, 64], strides = [1, 1, 1, 1]} : vector<3x3x2x64xbf16> to vector<1x1x2x64xbf16>
    %117 = vector.shape_cast %116 : vector<1x1x2x64xbf16> to vector<2x64xbf16>
    %cst_40 = arith.constant dense<0.000000e+00> : vector<2x256xf32>
    %118 = tpu.matmul %117, %101, %cst_40 {dimension_numbers = #tpu.dot_dimension_numbers<[1], [0], [0], [1], [0, 0, 1, 1], [], []>} : vector<2x64xbf16>, vector<64x256xbf16>, vector<2x256xf32> -> vector<2x256xf32>
    %119 = vector.extract_strided_slice %104 {offsets = [1, 0, 0, 0], sizes = [1, 1, 2, 64], strides = [1, 1, 1, 1]} : vector<3x3x2x64xbf16> to vector<1x1x2x64xbf16>
    %120 = vector.shape_cast %119 : vector<1x1x2x64xbf16> to vector<2x64xbf16>
    %cst_41 = arith.constant dense<0.000000e+00> : vector<2x256xf32>
    %121 = tpu.matmul %120, %102, %cst_41 {dimension_numbers = #tpu.dot_dimension_numbers<[1], [0], [0], [1], [0, 0, 1, 1], [], []>} : vector<2x64xbf16>, vector<64x256xbf16>, vector<2x256xf32> -> vector<2x256xf32>
    %122 = arith.addf %118, %121 : vector<2x256xf32>
    %123 = vector.extract_strided_slice %104 {offsets = [2, 0, 0, 0], sizes = [1, 1, 2, 64], strides = [1, 1, 1, 1]} : vector<3x3x2x64xbf16> to vector<1x1x2x64xbf16>
    %124 = vector.shape_cast %123 : vector<1x1x2x64xbf16> to vector<2x64xbf16>
    %cst_42 = arith.constant dense<0.000000e+00> : vector<2x256xf32>
    %125 = tpu.matmul %124, %103, %cst_42 {dimension_numbers = #tpu.dot_dimension_numbers<[1], [0], [0], [1], [0, 0, 1, 1], [], []>} : vector<2x64xbf16>, vector<64x256xbf16>, vector<2x256xf32> -> vector<2x256xf32>
    %126 = arith.addf %122, %125 : vector<2x256xf32>
    %c1_i32_43 = arith.constant 1 : i32
    %127 = tpu.dynamic_rotate %126 by %c1_i32_43 dim 1 : vector<2x256xf32>, i32 -> vector<2x256xf32>
    %cst_44 = arith.constant 0.000000e+00 : f32
    %128 = vector.shape_cast %22 : vector<1x256xi1> to vector<1x256xi1>
    %129 = vector.broadcast %128 : vector<1x256xi1> to vector<2x256xi1>
    %130 = vector.broadcast %cst_44 : f32 to vector<2x256xf32>
    %131 = arith.select %129, %127, %130 : vector<2x256xi1>, vector<2x256xf32>
    %132 = arith.addf %115, %131 : vector<2x256xf32>
    %133 = vector.extract_strided_slice %104 {offsets = [0, 2, 0, 0], sizes = [1, 1, 2, 64], strides = [1, 1, 1, 1]} : vector<3x3x2x64xbf16> to vector<1x1x2x64xbf16>
    %134 = vector.shape_cast %133 : vector<1x1x2x64xbf16> to vector<2x64xbf16>
    %cst_45 = arith.constant dense<0.000000e+00> : vector<2x256xf32>
    %135 = tpu.matmul %134, %101, %cst_45 {dimension_numbers = #tpu.dot_dimension_numbers<[1], [0], [0], [1], [0, 0, 1, 1], [], []>} : vector<2x64xbf16>, vector<64x256xbf16>, vector<2x256xf32> -> vector<2x256xf32>
    %136 = vector.extract_strided_slice %104 {offsets = [1, 2, 0, 0], sizes = [1, 1, 2, 64], strides = [1, 1, 1, 1]} : vector<3x3x2x64xbf16> to vector<1x1x2x64xbf16>
    %137 = vector.shape_cast %136 : vector<1x1x2x64xbf16> to vector<2x64xbf16>
    %cst_46 = arith.constant dense<0.000000e+00> : vector<2x256xf32>
    %138 = tpu.matmul %137, %102, %cst_46 {dimension_numbers = #tpu.dot_dimension_numbers<[1], [0], [0], [1], [0, 0, 1, 1], [], []>} : vector<2x64xbf16>, vector<64x256xbf16>, vector<2x256xf32> -> vector<2x256xf32>
    %139 = arith.addf %135, %138 : vector<2x256xf32>
    %140 = vector.extract_strided_slice %104 {offsets = [2, 2, 0, 0], sizes = [1, 1, 2, 64], strides = [1, 1, 1, 1]} : vector<3x3x2x64xbf16> to vector<1x1x2x64xbf16>
    %141 = vector.shape_cast %140 : vector<1x1x2x64xbf16> to vector<2x64xbf16>
    %cst_47 = arith.constant dense<0.000000e+00> : vector<2x256xf32>
    %142 = tpu.matmul %141, %103, %cst_47 {dimension_numbers = #tpu.dot_dimension_numbers<[1], [0], [0], [1], [0, 0, 1, 1], [], []>} : vector<2x64xbf16>, vector<64x256xbf16>, vector<2x256xf32> -> vector<2x256xf32>
    %143 = arith.addf %139, %142 : vector<2x256xf32>
    %c255_i32_48 = arith.constant 255 : i32
    %144 = tpu.dynamic_rotate %143 by %c255_i32_48 dim 1 : vector<2x256xf32>, i32 -> vector<2x256xf32>
    %cst_49 = arith.constant 0.000000e+00 : f32
    %145 = vector.shape_cast %24 : vector<1x256xi1> to vector<1x256xi1>
    %146 = vector.broadcast %145 : vector<1x256xi1> to vector<2x256xi1>
    %147 = vector.broadcast %cst_49 : f32 to vector<2x256xf32>
    %148 = arith.select %146, %144, %147 : vector<2x256xi1>, vector<2x256xf32>
    %149 = arith.addf %132, %148 : vector<2x256xf32>
    %c0_50 = arith.constant 0 : index
    %c0_51 = arith.constant 0 : index
    %150 = vector.load %arg5[%c0_50, %c0_51] : memref<2x1xf32, #tpu.memory_space<vmem>>, vector<2x1xf32>
    %151 = vector.broadcast %150 : vector<2x1xf32> to vector<2x256xf32>
    %152 = arith.addf %149, %151 : vector<2x256xf32>
    %c0_52 = arith.constant 0 : index
    %c0_53 = arith.constant 0 : index
    %c0_54 = arith.constant 0 : index
    %153 = vector.load %arg6[%c0_52, %c0_53, %c0_54] : memref<1x2x256xf32, #tpu.memory_space<vmem>>, vector<1x2x256xf32>
    %154 = vector.shape_cast %153 : vector<1x2x256xf32> to vector<2x256xf32>
    %155 = vector.shape_cast %152 : vector<2x256xf32> to vector<1x2x256xf32>
    tpu.vector_store %arg6[%c0_52, %c0_53, %c0_54], %155 {strides = array<i32>} : memref<1x2x256xf32, #tpu.memory_space<vmem>>, vector<1x2x256xf32>,
    return
  }
  func.func @transform_0(%arg0: i32) -> (i32, i32, i32) {
    %c0_i32 = arith.constant 0 : i32
    %c0_i32_0 = arith.constant 0 : i32
    %c0_i32_1 = arith.constant 0 : i32
    return %arg0, %c0_i32, %c0_i32_0 : i32, i32, i32
  }
  func.func @transform_1(%arg0: i32) -> (i32, i32, i32, i32) {
    %c0_i32 = arith.constant 0 : i32
    %c0_i32_0 = arith.constant 0 : i32
    %c0_i32_1 = arith.constant 0 : i32
    %c0_i32_2 = arith.constant 0 : i32
    %c0_i32_3 = arith.constant 0 : i32
    return %c0_i32, %c0_i32_0, %c0_i32_1, %c0_i32_2 : i32, i32, i32, i32
  }
  func.func @transform_2(%arg0: i32) -> (i32, i32) {
    %c0_i32 = arith.constant 0 : i32
    %c0_i32_0 = arith.constant 0 : i32
    %c0_i32_1 = arith.constant 0 : i32
    return %c0_i32, %c0_i32_0 : i32, i32
  }
  func.func @transform_3(%arg0: i32) -> (i32, i32, i32, i32) {
    %c0_i32 = arith.constant 0 : i32
    %c0_i32_0 = arith.constant 0 : i32
    %c0_i32_1 = arith.constant 0 : i32
    %c0_i32_2 = arith.constant 0 : i32
    %c0_i32_3 = arith.constant 0 : i32
    return %c0_i32, %c0_i32_0, %c0_i32_1, %c0_i32_2 : i32, i32, i32, i32
  }
  func.func @transform_4(%arg0: i32) -> (i32, i32) {
    %c0_i32 = arith.constant 0 : i32
    %c0_i32_0 = arith.constant 0 : i32
    %c0_i32_1 = arith.constant 0 : i32
    return %c0_i32, %c0_i32_0 : i32, i32
  }
  func.func @transform_5(%arg0: i32) -> (i32, i32, i32) {
    %c0_i32 = arith.constant 0 : i32
    %c0_i32_0 = arith.constant 0 : i32
    %c0_i32_1 = arith.constant 0 : i32
    return %arg0, %c0_i32, %c0_i32_0 : i32, i32, i32
  }
}

</mosaic_0001>

<bundles_post_ra>
// kernel: flow_head.1
= control target key start
LH: loop header
LB: loop body
LE: loop exit
PB: predicated region body
PF: predicated region fallthrough
CT: control target
= control target key end

     0   :  { %10 = vsyncpa [#allocation3], 0  ;;  %s4417_s0 = inlined_call_operand.hbm [shape: f32[2,32,256], index: 0, kind: input, shape index: {}]   ;;  %s4418_s1 = inlined_call_operand.hbm [shape: bf16[3,3,64,32], index: 1, kind: input, shape index: {}]   ;;  %s4419_s2 = inlined_call_operand.hbm [shape: f32[64,1], index: 2, kind: input, shape index: {}]   ;;  %s4420_s3 = inlined_call_operand.hbm [shape: bf16[3,3,2,64], index: 3, kind: input, shape index: {}]   ;;  %s4421_s4 = inlined_call_operand.hbm [shape: f32[2,1], index: 4, kind: input, shape index: {}]   ;;  %s4422_s5 = inlined_call_operand.hbm [shape: f32[2,2,256], index: 5, kind: output, shape index: {}]  }
   0x1   :  { %12 = vsyncpa [#allocation3 + $0x1], 0 }
   0x2   :  { %13 = vsyncpa [#allocation6], 0 }
   0x3   :  { %14 = vsyncpa [#allocation9], 0 }
   0x4   :  { %15 = vsyncpa [#allocation4], 0 }
   0x5   :  { %17 = vsyncpa [#allocation4 + $0x1], 0  ;;  %s3325_s18 = smov 0   ;;  %s3327_s19 = smov 0  }
   0x6   :  { %s3329_s20 = smov 0   ;;  %s3331_s21 = smov 0  }
   0x7 LB: > { %s3346_s22 = sadd.s32 4294967295, %s3275_s21   ;;  %s2472_s23 = sadd.s32 4294967294, %s3275_s21   ;;  %s3275_s21 = sphi %s3331_s21, %s4457_s21   ;;  %s3271_s20 = sphi %s3329_s20, %s4456_s20   ;;  %s3267_s19 = sphi %s3327_s19, %s4455_s19   ;;  %s3263_s18 = sphi %s3325_s18, %s4454_s18  }
   0x8   : > { %p43_p0 = scmp.ne.s32.totalorder %s3267_s19, %s3263_s18  ;;  %p4423_p1 = scmp.eq.s32.totalorder %s3346_s22, 0 }
   0x9   : > { %p157_p3 = scmp.eq.s32.totalorder %s2472_s23, 1  ;;  %p2473_p5 = scmp.ge.s32.totalorder %s3275_s21, 1 }
   0xa   : > { %p3355_p4 = por %p4423_p1, %p43_p0  ;;  %p164_p7 = scmp.lt.s32.totalorder %s3275_s21, 3 }
   0xb   : > { %p3360_p6 = por %p157_p3, %p43_p0  ;;  %s3277_s27 = smov [#allocation5]  }
   0xc   : > { %s4426_s24 = scalar_select %p3355_p4, 1, 0 }
   0xd   : > { %s4427_s25 = scalar_select %p3360_p6, 1, 0 }
   0xe   : > { %p3365_p8 = pnand %p2473_p5, %p164_p7  ;;  %s176_s28 = sshll.u32 %s3277_s27, 4  ;;  %s3369_s28 = int_to_ptr.vmem [resolvable:$true] %s176_s28 }
   0xf   : > { %s3278_s30 = smov [#allocation8]   ;;  %s3059_s9 = scalar_lea.hbm %s4418_s1, 4608 }
  0x10   : > { %s4428_s26 = scalar_select %p3365_p8, 1, 0 }
  0x11   : > { %p2822_p9 = pneg %p3365_p8  ;;  %s202_s6 = sshll.u32 %s3278_s30, 4  ;;  %s3380_s6 = int_to_ptr.vmem [resolvable:$true] %s202_s6 }
  0x12   : > { %p3060_p12 = scmp.ne.s32.totalorder %s4418_s1, %s3059_s9  ;;  %p3066_p5 = scmp.lt.u32.totalorder %s3059_s9, %s4418_s1 }
  0x13   : > { %p3376_p11 = pnand %p2822_p9, %p4423_p1 }
  0x15   : > { %p3390_p13 = pneg %p3376_p11 }
  0x17   : > { %p3062_p0 = pnand %p3390_p13, %p3060_p12 }
  0x19   : > { %p3063_p3 = pneg %p3062_p0 }
  0x1b   : > { %p3068_p7 = pnand %p3066_p5, %p3063_p3 }
  0x1d   : > { %3071 = shalt.err (!%p3068_p7)
}
  0x1e   : > { %s3072_s15 = scalar_lea.vmem %s3369_s28, 4608  ;;  %p3080_p2 = scmp.lt.s32.totalorder %s3369_s28, %s3369_s28 }
  0x1f   : > { %p3073_p9 = scmp.ne.s32.totalorder %s3369_s28, %s3072_s15  ;;  %p3081_p6 = scmp.lt.s32.totalorder %s3072_s15, %s3072_s15 }
  0x21   : > { %p3075_p10 = pnand %p3073_p9, %p3390_p13  ;;  %p3082_p12 = por %p3081_p6, %p3080_p2 }
  0x23   : > { %p3076_p1 = pneg %p3075_p10 }
  0x25   : > { %p3083_p0 = pnand %p3082_p12, %p3076_p1 }
  0x27   : > { %3086 = shalt.err (!%p3083_p0)
}
  0x28   : > { %s3279_s16 = smov 64   ;;  %s3280_s17 = smov 4  }
  0x29   : > { %2825 = dma.hbm_to_vmem [thread:$0]  (!%p3376_p11), %s4418_s1, 4608, %s3369_s28, [#allocation6], %s3279_s16, %s3279_s16, %s3280_s17  }
  0x2a   : > { %s3087_s8 = scalar_lea.hbm %s4420_s3, 144 }
  0x2b   : > { %p3088_p2 = scmp.ne.s32.totalorder %s4420_s3, %s3087_s8  ;;  %p3094_p10 = scmp.lt.u32.totalorder %s3087_s8, %s4420_s3 }
  0x2d   : > { %p3090_p1 = pnand %p3088_p2, %p3390_p13 }
  0x2f   : > { %p3091_p6 = pneg %p3090_p1 }
  0x31   : > { %p3096_p3 = pnand %p3094_p10, %p3091_p6 }
  0x33   : > { %3099 = shalt.err (!%p3096_p3)
}
  0x34   : > { %s3100_s28 = scalar_lea.vmem %s3380_s6, 144  ;;  %s3107_s14 = scalar_lea.vmem %s3380_s6, 160 }
  0x35   : > { %p3101_p5 = scmp.ne.s32.totalorder %s3380_s6, %s3100_s28  ;;  %p3108_p12 = scmp.lt.s32.totalorder %s3380_s6, %s3380_s6 }
  0x36   : > { %p3109_p0 = scmp.lt.s32.totalorder %s3107_s14, %s3100_s28 }
  0x37   : > { %p3103_p7 = pnand %p3101_p5, %p3390_p13 }
  0x38   : > { %p3110_p2 = por %p3109_p0, %p3108_p12 }
  0x39   : > { %p3104_p9 = pneg %p3103_p7 }
  0x3b   : > { %p3111_p1 = pnand %p3110_p2, %p3104_p9 }
  0x3d   : > { %3114 = shalt.err (!%p3111_p1)
}
  0x3e   : > { %s3281_s15 = smov 16   ;;  %s3282_s16 = smov 1  }
  0x3f   : > { %2831 = dma.hbm_to_vmem [thread:$0]  (!%p3376_p11), %s4420_s3, 144, %s3380_s6, [#allocation9], %s3281_s15, %s3281_s15, %s3282_s16  }
  0x40   : > { %s3283_s27 = smov [#allocation7]   ;;  %s3115_s9 = scalar_lea.hbm %s4419_s2, 1024 }
  0x41   : > { %s189_s30 = sshll.u32 %s3283_s27, 4  ;;  %p3116_p6 = scmp.ne.s32.totalorder %s4419_s2, %s3115_s9  ;;  %s190_s30 = int_to_ptr.vmem [resolvable:$true] %s189_s30 }
  0x42   : > { %p3122_p5 = scmp.lt.u32.totalorder %s3115_s9, %s4419_s2 }
  0x43   : > { %p3118_p10 = pnand %p3116_p6, %p3390_p13 }
  0x45   : > { %p3119_p3 = pneg %p3118_p10 }
  0x47   : > { %p3124_p7 = pnand %p3122_p5, %p3119_p3 }
  0x49   : > { %3127 = shalt.err (!%p3124_p7)
}
  0x4a   : > { %s3128_s6 = scalar_lea.vmem %s190_s30, 1024  ;;  %p3136_p2 = scmp.lt.s32.totalorder %s190_s30, %s190_s30 }
  0x4b   : > { %p3129_p9 = scmp.ne.s32.totalorder %s190_s30, %s3128_s6  ;;  %p3137_p1 = scmp.lt.s32.totalorder %s3128_s6, %s3128_s6 }
  0x4d   : > { %p3131_p12 = pnand %p3129_p9, %p3390_p13  ;;  %p3138_p4 = por %p3137_p1, %p3136_p2 }
  0x4f   : > { %p3132_p0 = pneg %p3131_p12 }
  0x51   : > { %p3139_p8 = pnand %p3138_p4, %p3132_p0 }
  0x53   : > { %3142 = shalt.err (!%p3139_p8)
}
  0x54   : > { %s3284_s14 = smov 128   ;;  %s3285_s16 = smov 8  }
  0x55   : > { %2828 = dma.hbm_to_vmem [thread:$0]  (!%p3376_p11), %s4419_s2, 1024, %s190_s30, [#allocation6], %s3284_s14, %s3284_s14, %s3285_s16  }
  0x56   : > { %s3286_s27 = smov [#allocation10]   ;;  %s3143_s10 = scalar_lea.hbm %s4421_s4, 32 }
  0x57   : > { %s216_s7 = sshll.u32 %s3286_s27, 4  ;;  %p3144_p4 = scmp.ne.s32.totalorder %s4421_s4, %s3143_s10  ;;  %s217_s7 = int_to_ptr.vmem [resolvable:$true] %s216_s7 }
  0x58   : > { %p3150_p10 = scmp.lt.u32.totalorder %s3143_s10, %s4421_s4 }
  0x59   : > { %p3146_p8 = pnand %p3144_p4, %p3390_p13 }
  0x5b   : > { %p3147_p6 = pneg %p3146_p8 }
  0x5d   : > { %p3152_p3 = pnand %p3150_p10, %p3147_p6 }
  0x5f   : > { %3155 = shalt.err (!%p3152_p3)
}
  0x60   : > { %s3156_s30 = scalar_lea.vmem %s217_s7, 32  ;;  %p3164_p12 = scmp.lt.s32.totalorder %s217_s7, %s217_s7 }
  0x61   : > { %p3157_p5 = scmp.ne.s32.totalorder %s217_s7, %s3156_s30  ;;  %p3165_p0 = scmp.lt.s32.totalorder %s3156_s30, %s3156_s30 }
  0x63   : > { %p3159_p7 = pnand %p3157_p5, %p3390_p13  ;;  %p3166_p2 = por %p3165_p0, %p3164_p12 }
  0x65   : > { %p3160_p9 = pneg %p3159_p7 }
  0x67   : > { %p3167_p1 = pnand %p3166_p2, %p3160_p9 }
  0x69   : > { %3170 = shalt.err (!%p3167_p1)
}
  0x6a   : > { %2834 = dma.hbm_to_vmem [thread:$0]  (!%p3376_p11), %s4421_s4, 32, %s217_s7, [#allocation9]  }
  0x6b   : > { %s3474_s12 = sadd.s32 1, %s3275_s21   ;;  %s30_s17 = sadd.s32 1, %s3271_s20 }
  0x6c   : > { %s27_s29 = ssub.s32 %s3275_s21, %s3474_s12  ;;  %p37_p13 = scmp.ne.s32.totalorder %s3271_s20, %s3267_s19 }
  0x6d   : > { %p28_p4 = scmp.eq.s32.totalorder %s27_s29, 0  ;;  %p38_p8 = scmp.eq.s32.totalorder %s3275_s21, 0 }
  0x6e   : > { %p4431_p6 = scmp.eq.s32.totalorder %s3346_s22, 1  ;;  %p2847_p3 = scmp.lt.s32.totalorder %s3275_s21, 2 }
  0x6f   : > { %s3490_s27 = scalar_select %p28_p4, %s3271_s20, %s30_s17  }
  0x70   : > { %p3484_p10 = por %p4431_p6, %p37_p13  ;;  %p39_p5 = por %p38_p8, %p37_p13 }
  0x71   : > { %s227_s8 = sand.u32 1, %s3271_s20   ;;  %s2684_s7 = sshll.u32 %s3275_s21, 10 }
  0x72   : > { %s2479_s9 = sshll.u32 %s227_s8, 6  ;;  %s3497_s13 = scalar_lea.hbm %s4417_s0, %s2684_s7 }
  0x73   : > { %s231_s28 = scalar_lea.vmem [#allocation2], %s2479_s9  ;;  %p3501_p11 = pnand %p2847_p3, %p39_p5 }
  0x74   : > { %s238_s6 = sshll.u32 %s231_s28, 4  ;;  %s3505_s14 = scalar_lea.sflag [#allocation3], %s227_s8  ;;  %s3499_s6 = int_to_ptr.vmem [resolvable:$true] %s238_s6 }
  0x75   : > { %s3171_s16 = scalar_lea.hbm %s3497_s13, 1024  ;;  %p3173_p9 = pneg %p3501_p11 }
  0x76   : > { %p3172_p7 = scmp.ne.s32.totalorder %s3497_s13, %s3171_s16  ;;  %s3176_s9 = scalar_lea.hbm %s4417_s0, 2048 }
  0x77   : > { %p3177_p2 = scmp.lt.u32.totalorder %s3497_s13, %s4417_s0  ;;  %p3178_p1 = scmp.lt.u32.totalorder %s3176_s9, %s3171_s16 }
  0x78   : > { %p3174_p12 = pnand %p3173_p9, %p3172_p7  ;;  %p3180_p4 = scmp.lt.u32.totalorder %s3171_s16, %s3497_s13 }
  0x79   : > { %p3179_p13 = por %p3178_p1, %p3177_p2 }
  0x7a   : > { %p3175_p0 = pneg %p3174_p12 }
  0x7b   : > { %p3181_p8 = por %p3180_p4, %p3179_p13 }
  0x7d   : > { %p3182_p6 = pnand %p3181_p8, %p3175_p0 }
  0x7f   : > { %3185 = shalt.err (!%p3182_p6)
}
  0x80   : > { %s3186_s8 = scalar_lea.vmem %s3499_s6, 1024  ;;  %s3287_s11 = smov [#allocation2]  }
  0x81   : > { %p3187_p3 = scmp.ne.s32.totalorder %s3499_s6, %s3186_s8  ;;  %s3191_s28 = sshll.u32 %s3287_s11, 4  ;;  %s3192_s28 = int_to_ptr.vmem [resolvable:$false] %s3191_s28 }
  0x82   : > { %s3193_s17 = scalar_lea.vmem %s3192_s28, 2048  ;;  %p3194_p12 = scmp.lt.s32.totalorder %s3499_s6, %s3192_s28 }
  0x83   : > { %p3189_p5 = pnand %p3187_p3, %p3173_p9  ;;  %p3195_p2 = scmp.lt.s32.totalorder %s3193_s17, %s3186_s8 }
  0x85   : > { %p3190_p7 = pneg %p3189_p5  ;;  %p3196_p1 = por %p3195_p2, %p3194_p12 }
  0x87   : > { %p3197_p13 = pnand %p3196_p1, %p3190_p7 }
  0x89   : > { %3200 = shalt.err (!%p3197_p13)
}
  0x8a   : > { %s3288_s16 = smov 256   ;;  %p4434_p9 = scmp.ne.s32.totalorder %s4428_s26, 0 }
  0x8b   : > { %2838 = dma.hbm_to_vmem [thread:$0]  (!%p3501_p11), %s3497_s13, 1024, %s3499_s6, %s3505_s14, %s3288_s16, %s3288_s16, %s3281_s15  }
  0x8c   : > { %250 = sbr.rel (%p4434_p9) target bundleno = 1327 (0x52f), region = 40  ;;  %s3537_s29 = sand.u32 (!%p4434_p9), 1, %s3267_s19  }
  0x8d   : > { %s2483_s9 = sshll.u32 (!%p4434_p9), %s3537_s29, 6  ;;  %s253_s7 = scalar_lea.sflag (!%p4434_p9), [#allocation3], %s3537_s29 }
  0x8e   : > { %s256_s10 = scalar_lea.vmem (!%p4434_p9), [#allocation2], %s2483_s9  ;;  %p4435_p0 = scmp.ne.s32.totalorder (!%p4434_p9), %s4426_s24, 0 }
  0x93   : > { %3246 = dma.done.wait (%p4435_p0), %s253_s7, 1024  }
  0x94   : > { %3248 = vsyncadd (%p4435_p0), %s253_s7, 4294966272  ;;  %p4436_p4 = scmp.eq.s32.totalorder %s3346_s22, 0 }
  0x96   : > { %3250 = dma.done.wait (%p4436_p4), [#allocation6], 5632   ;;  %p4437_p11 = pmov %p4436_p4 }
  0x97   : > { %p4438_p8 = pmov %p4436_p4 }
  0x98   : > { %3252 = vsyncadd (%p4437_p11), [#allocation6], 4294961664 }
  0x99   : > { %3254 = dma.done.wait (%p4438_p8), [#allocation9], 176   ;;  %p4439_p6 = pmov %p4436_p4 }
  0x9a   : > { %v3289_v0 = vmov 0   ;;  %v335_v1 = vld [vmem:[%s256_s10] sm:$0xff]  ;;  %v337_v2 = vld [vmem:[%s256_s10 + $0x10] sm:$0xff]  ;;  %v336_v6 = vld [vmem:[%s256_s10 + $0x8] sm:$0xff]  ;;  %s3290_s24 = smov 16   ;;  %vm521_vm0 = vcmask 261120   ;;  %v300_v25 = vlaneseq }
  0x9b   : > { %3256 = vsyncadd (%p4439_p6), [#allocation9], 4294967120  ;;  %576 = vmatprep.mubr.bf16.mxu1 %v3289_v0  ;;  %566 = vmatprep.mubr.bf16.mxu0 %v3289_v0  ;;  %v339_v3 = vld [vmem:[%s256_s10 + $0x20] sm:$0xff]  ;;  %v2901_v4 = vpack.i.bf16 %v337_v2, %v335_v1  ;;  %v341_v5 = vld [vmem:[%s256_s10 + $0x30] sm:$0xff]  ;;  %v3557_v8 = vpack.c.bf16 %v337_v2, %v335_v1  ;;  %s3291_s26 = smov 112   ;;  %s3292_s15 = smov 1  }
  0x9c   : > { %2942 = vset.pattern.permute.xlu1 %v3289_v0  ;;  %2941 = vset.pattern.permute.xlu0 %v3289_v0  ;;  %v338_v7 = vld [vmem:[%s256_s10 + $0x18] sm:$0xff]  ;;  %v2911_v9 = vpack.i.bf16 %v341_v5, %v339_v3  ;;  %v340_v10 = vld [vmem:[%s256_s10 + $0x28] sm:$0xff]  ;;  %v3567_v16 = vpack.c.bf16 %v341_v5, %v339_v3  ;;  %v3029_v18 = vld [vmem:[#allocation5 + $0x80] sm:$0xff]   ;;  %v3601_v26 = vand.u32 127, %v300_v25  ;;  %s3293_s13 = smov 127   ;;  %vm1906_vm13 = vcmask 523264  }
  0x9d   : > { %v342_v11 = vld [vmem:[%s256_s10 + $0x38] sm:$0xff]  ;;  %2902 = vrot.lane.b32.xlu0 %v2901_v4, %s3290_s24  ;;  %v2906_v12 = vpack.i.bf16 %v338_v7, %v336_v6  ;;  %v3560_v13 = vpack.c.bf16 %v338_v7, %v336_v6  ;;  %v3023_v17 = vld [vmem:[#allocation5 + $0x88] sm:$0xff]   ;;  %v3024_v19 = vld [vmem:[#allocation5 + $0x90] sm:$0xff]   ;;  %s2488_s6 = sshll.u32 %s3537_s29, 2  ;;  %s2685_s30 = sshll.u32 %s3346_s22, 6 }
  0x9e   : > { %2912 = vrot.lane.b32.xlu1 %v2911_v9, %s3290_s24  ;;  %v2916_v14 = vpack.i.bf16 %v342_v11, %v340_v10  ;;  %v3563_v15 = vpack.c.bf16 %v342_v11, %v340_v10  ;;  %v3025_v20 = vld [vmem:[#allocation5 + $0x98] sm:$0xff]   ;;  %v3026_v21 = vld [vmem:[#allocation5 + $0x60] sm:$0xff]   ;;  %v3027_v22 = vld [vmem:[#allocation5 + $0x68] sm:$0xff]   ;;  %vm359_vm1 = vcmp.lt.s32.totalorder %v3601_v26, 16  ;;  %vm327_vm2 = vcmp.ge.s32.totalorder %v3601_v26, 16  ;;  %s298_s14 = scalar_lea.vmem [#allocation11], %s2488_s6  ;;  %s4373_s17 = scalar_lea.hbm %s4422_s5, %s2685_s30 }
  0x9f   : > { %2686 = vmatprep.subr.bf16.mxu1 %v3560_v13  ;;  %534 = vmatprep.subr.bf16.mxu0 %v3560_v13  ;;  %v3028_v23 = vld [vmem:[#allocation5 + $0x70] sm:$0xff]   ;;  %v3030_v24 = vld [vmem:[#allocation5 + $0x78] sm:$0xff]   ;;  %v3606_v32 = vadd.s32 128, %v3601_v26  ;;  %vm396_vm3 = vcmp.lt.s32.totalorder %v3601_v26, 112  ;;  %vm3626_vm4 = vmpackc.low %vm327_vm2, %vm327_vm2  ;;  %vm1196_vm7 = vcmp.lt.s32.totalorder %v3601_v26, 1  ;;  %vm1612_vm12 = vcmp.lt.s32.totalorder %v3601_v26, 127 }
  0xa0   : > { %2688 = vmatpush1.bf16.msra.mxu1 %v3557_v8  ;;  %535 = vmatpush1.bf16.msra.mxu0 %v3557_v8  ;;  %v3031_v6 = vld [vmem:[#allocation5 + $0x20] sm:$0xff]   ;;  %v3037_v25 = vld [vmem:[#allocation5 + $0x38] sm:$0xff]   ;;  %s2364_s8 = sshll.u32 %s298_s14, 4  ;;  %s2350_s16 = scalar_lea.sflag [#allocation4], %s3537_s29  ;;  %s4375_s8 = int_to_ptr.vmem [resolvable:$true] %s2364_s8 }
  0xa1   : > { %2907 = vrot.lane.b32.xlu0 %v2906_v12, %s3290_s24  ;;  %2687 = vmatprep.subr.bf16.mxu1 %v3563_v15  ;;  %vm330_vm5 = vcmp.lt.s32.totalorder %v3606_v32, 240  ;;  %v3032_v7 = vld [vmem:[#allocation5] sm:$0xff]   ;;  %s3201_s9 = scalar_lea.vmem %s4375_s8, 64  ;;  %s3294_s22 = smov [#allocation11]  }
  0xa2   : > { %2917 = vrot.lane.b32.xlu1 %v2916_v14, %s3290_s24  ;;  %536 = vmatprep.subr.bf16.mxu0 %v3563_v15  ;;  %vm3662_vm6 = vmpackc.low %vm330_vm5, %vm330_vm5  ;;  %v1903_v47 = vld [vmem:[#allocation8 + $0x6] sm:$0x1]  ;;  %p3202_p3 = scmp.ne.s32.totalorder %s4375_s8, %s3201_s9  ;;  %s3205_s7 = sshll.u32 %s3294_s22, 4  ;;  %s3206_s7 = int_to_ptr.vmem [resolvable:$false] %s3205_s7 }
  0xa3   : > { %s3207_s10 = scalar_lea.vmem %s3206_s7, 128  ;;  %p3208_p12 = scmp.lt.s32.totalorder %s4375_s8, %s3206_s7 }
  0xa4   : > { %2689 = vmatpush1.bf16.msra.mxu1 %v3567_v16  ;;  %537 = vmatpush1.bf16.msra.mxu0 %v3567_v16  ;;  %p3203_p5 = pnand %p3202_p3, %p3484_p10  ;;  %p3209_p2 = scmp.lt.s32.totalorder %s3207_s10, %s3201_s9 }
  0xa5   : > { %2922 = vrot.lane.b32.xlu0 %v2901_v4, %s3291_s26  ;;  %865 = vmatprep.subr.bf16.mxu1 %v3560_v13 }
  0xa6   : > { %2927 = vrot.lane.b32.xlu1 %v2906_v12, %s3291_s26  ;;  %p3204_p7 = pneg %p3203_p5  ;;  %p3210_p1 = por %p3209_p2, %p3208_p12 }
  0xa7   : > { %2494 = vmatmul.mubr.msk.bf16.vlgmr.msra.gmra.mrb[0].mxu1 %vm521_vm0, %v3023_v17  ;;  %2493 = vmatmul.mubr.msk.bf16.vlgmr.msra.gmra.mrb[0].mxu0 %vm521_vm0, %v3029_v18 }
  0xa8   : > { %586 = vmatprep.mubr.bf16.mxu1 %v3289_v0  ;;  %866 = vmatpush1.bf16.msra.mxu1 %v3557_v8  ;;  %p3211_p13 = pnand %p3210_p1, %p3204_p7 }
  0xa9   : > { %2932 = vrot.lane.b32.xlu0 %v2911_v9, %s3291_s26  ;;  %867 = vmatprep.subr.bf16.mxu1 %v3563_v15 }
  0xaa   : > { %2937 = vrot.lane.b32.xlu1 %v2916_v14, %s3291_s26  ;;  %671 = vmatprep.mubr.bf16.mxu0 %v3289_v0 }
  0xac   : > { %868 = vmatpush1.bf16.msra.mxu1 %v3567_v16 }
  0xaf   : > { %2495 = vmatmul.mubr.msk.bf16.gmra.mrb[4].mxu1 %vm521_vm0, %v3024_v19 }
  0xb0   : > { %596 = vmatprep.mubr.bf16.mxu1 %v3289_v0 }
  0xb7   : > { %2496 = vmatmul.mubr.msk.bf16.gmra.mrb[8].mxu1 %vm521_vm0, %v3025_v20 }
  0xb8   : > { %897 = vmatprep.mubr.bf16.mxu1 %v3289_v0 }
  0xbf   : > { %2529 = vmatmul.mubr.msk.bf16.vlgmr.msra.gmra.mrb[12].mxu1 %vm521_vm0, %v3026_v21  ;;  %v3033_v21 = vld [vmem:[#allocation5 + $0x28] sm:$0xff]  }
  0xc0   : > { %907 = vmatprep.mubr.bf16.mxu1 %v3289_v0 }
  0xc7   : > { %2530 = vmatmul.mubr.msk.bf16.gmra.mrb[16].mxu1 %vm521_vm0, %v3027_v22  ;;  %v3034_v22 = vld [vmem:[#allocation5 + $0x8] sm:$0xff]  }
  0xc8   : > { %917 = vmatprep.mubr.bf16.mxu1 %v3289_v0 }
  0xcf   : > { %2531 = vmatmul.mubr.msk.bf16.gmra.mrb[20].mxu1 %vm521_vm0, %v3028_v23  ;;  %v3035_v23 = vld [vmem:[#allocation5 + $0x30] sm:$0xff]  }
  0xd0   : > { %927 = vmatprep.mubr.bf16.mxu1 %v3289_v0 }
  0xd7   : > { %2532 = vmatmul.mubr.msk.bf16.gmra.mrb[24].mxu1 %vm521_vm0, %v3030_v24  ;;  %v3036_v24 = vld [vmem:[#allocation5 + $0x10] sm:$0xff]  }
  0xd8   : > { %1002 = vmatprep.mubr.bf16.mxu1 %v3289_v0 }
 0x10f   : > { %v2903_v27 = vpop.permute.xlu0 %2902 }
 0x110   : > { %v2913_v28 = vpop.permute.xlu1 %2912  ;;  %v2905_v29 = vunpack.i.h.bf16 %v2903_v27  ;;  %v2904_v33 = vunpack.i.l.bf16 %v2903_v27  ;;  %v1666_v27 = vld [vmem:[#allocation7 + $0x8] sm:$0xff] }
 0x111   : > { %v2914_v30 = vunpack.i.l.bf16 %v2913_v28  ;;  %v2915_v34 = vunpack.i.h.bf16 %v2913_v28  ;;  %v1665_v28 = vld [vmem:[#allocation7] sm:$0xff]  ;;  %1680 = vperm.xlu1 %2942, %v1666_v27  }
 0x112   : > { %1675 = vperm.xlu0 %2941, %v1665_v28  }
 0x113   : > { %v2908_v31 = vpop.permute.xlu0 %2907 }
 0x114   : > { %v2910_v35 = vunpack.i.h.bf16 %v2908_v31  ;;  %v2909_v36 = vunpack.i.l.bf16 %v2908_v31  ;;  %v2918_v37 = vpop.permute.xlu1 %2917  ;;  %v3039_v31 = vld [vmem:[#allocation5 + $0xe0] sm:$0xff]  }
 0x115   : > { %v2920_v38 = vunpack.i.h.bf16 %v2918_v37  ;;  %v2919_v39 = vunpack.i.l.bf16 %v2918_v37  ;;  %v3042_v37 = vld [vmem:[#allocation5 + $0xc8] sm:$0xff]  }
 0x116   : > { %v364_v40 = vsel %vm359_vm1, %v2909_v36, %v2904_v33  ;;  %v365_v41 = vsel %vm359_vm1, %v2910_v35, %v2905_v29  ;;  %v360_v42 = vsel %vm359_vm1, %v2904_v33, %v2909_v36  ;;  %v361_v43 = vsel %vm359_vm1, %v2905_v29, %v2910_v35  ;;  %v1667_v29 = vld [vmem:[#allocation7 + $0x10] sm:$0xff]  ;;  %v3040_v33 = vld [vmem:[#allocation5 + $0xc0] sm:$0xff]   ;;  %v1670_v35 = vld [vmem:[#allocation7 + $0x28] sm:$0xff] }
 0x117   : > { %v3617_v44 = vpack.c.bf16 %v365_v41, %v364_v40  ;;  %v366_v45 = vsel %vm359_vm1, %v2919_v39, %v2914_v30  ;;  %v3621_v46 = vpack.c.bf16 %v361_v43, %v360_v42  ;;  %v2923_v48 = vpop.permute.xlu0 %2922  ;;  %v367_v49 = vsel %vm359_vm1, %v2920_v38, %v2915_v34  ;;  %1685 = vperm.xlu1 %2942, %v1667_v29   ;;  %v3041_v36 = vld [vmem:[#allocation5 + $0xe8] sm:$0xff]   ;;  %v3046_v40 = vld [vmem:[#allocation5 + $0xd8] sm:$0xff]   ;;  %v3047_v41 = vld [vmem:[#allocation5 + $0xa0] sm:$0xff]  }
 0x118   : > { %v362_v50 = vsel %vm359_vm1, %v2914_v30, %v2919_v39  ;;  %v363_v51 = vsel %vm359_vm1, %v2915_v34, %v2920_v38  ;;  %v2928_v52 = vpop.permute.xlu1 %2927  ;;  %v2925_v53 = vunpack.i.h.bf16 %v2923_v48  ;;  %v2924_v57 = vunpack.i.l.bf16 %v2923_v48  ;;  %v1668_v30 = vld [vmem:[#allocation7 + $0x18] sm:$0xff]  ;;  %v1669_v34 = vld [vmem:[#allocation7 + $0x20] sm:$0xff]  ;;  %v1671_v38 = vld [vmem:[#allocation7 + $0x30] sm:$0xff] }
 0x119   : > { %639 = vmatprep.subr.bf16.mxu0 %v3621_v46  ;;  %970 = vmatprep.subr.bf16.mxu1 %v3621_v46  ;;  %v3639_v54 = vpack.c.bf16 %v363_v51, %v362_v50  ;;  %v2930_v55 = vunpack.i.h.bf16 %v2928_v52  ;;  %v2929_v56 = vunpack.i.l.bf16 %v2928_v52  ;;  %v3655_v62 = vpack.c.bf16 %v367_v49, %v366_v45  ;;  %v1672_v39 = vld [vmem:[#allocation7 + $0x38] sm:$0xff]  ;;  %v3048_v42 = vld [vmem:[#allocation5 + $0xa8] sm:$0xff]   ;;  %v3049_v43 = vld [vmem:[#allocation5 + $0xb0] sm:$0xff]  }
 0x11a   : > { %2503 = vmatpush1.bf16.msk.msra.mxu0 %vm3626_vm4, %v3617_v44  ;;  %2539 = vmatpush1.bf16.msk.msra.mxu1 %vm3626_vm4, %v3617_v44  ;;  %v3051_v49 = vld [vmem:[#allocation5 + $0x40] sm:$0xff]  }
 0x11b   : > { %641 = vmatprep.subr.bf16.mxu0 %v3639_v54  ;;  %972 = vmatprep.subr.bf16.mxu1 %v3639_v54  ;;  %v398_v58 = vsel %vm396_vm3, %v2925_v53, %v2930_v55  ;;  %v402_v59 = vsel %vm396_vm3, %v2930_v55, %v2925_v53  ;;  %v397_v60 = vsel %vm396_vm3, %v2924_v57, %v2929_v56  ;;  %v2933_v61 = vpop.permute.xlu0 %2932 }
 0x11c   : > { %v401_v63 = vsel %vm396_vm3, %v2929_v56, %v2924_v57  ;;  %v2938_v2 = vpop.permute.xlu1 %2937  ;;  %v2935_v3 = vunpack.i.h.bf16 %v2933_v61  ;;  %v2934_v4 = vunpack.i.l.bf16 %v2933_v61  ;;  %v3668_v11 = vpack.c.bf16 %v398_v58, %v397_v60  ;;  %1690 = vperm.xlu0 %2941, %v1668_v30   ;;  %1695 = vperm.xlu1 %2942, %v1669_v34   ;;  %v3054_v61 = vld [vmem:[#allocation5 + $0x58] sm:$0xff]  }
 0x11d   : > { %v3666_v5 = vpack.c.bf16 %v402_v59, %v401_v63  ;;  %v2940_v9 = vunpack.i.h.bf16 %v2938_v2  ;;  %v2939_v10 = vunpack.i.l.bf16 %v2938_v2  ;;  %v3053_v59 = vld [vmem:[#allocation5 + $0x50] sm:$0xff]   ;;  %v3056_v63 = vld [vmem:[#allocation5 + $0x108] sm:$0xff]  }
 0x11e   : > { %2506 = vmatpush1.bf16.msk.msra.mxu0 %vm3626_vm4, %v3655_v62  ;;  %2542 = vmatpush1.bf16.msk.msra.mxu1 %vm3626_vm4, %v3655_v62  ;;  %v3057_v2 = vld [vmem:[#allocation5 + $0x110] sm:$0xff]  }
 0x11f   : > { %2517 = vmatprep.subr.msk.bf16.mxu0 %vm3662_vm6, %v3666_v5  ;;  %2553 = vmatprep.subr.msk.bf16.mxu1 %vm3662_vm6, %v3666_v5  ;;  %v400_v12 = vsel %vm396_vm3, %v2935_v3, %v2940_v9  ;;  %v404_v14 = vsel %vm396_vm3, %v2940_v9, %v2935_v3  ;;  %v399_v17 = vsel %vm396_vm3, %v2934_v4, %v2939_v10  ;;  %v3058_v3 = vld [vmem:[#allocation5 + $0x118] sm:$0xff]  }
 0x120   : > { %v403_v18 = vsel %vm396_vm3, %v2939_v10, %v2934_v4  ;;  %v3696_v20 = vpack.c.bf16 %v400_v12, %v399_v17  ;;  %1700 = vperm.xlu0 %2941, %v1670_v35   ;;  %1705 = vperm.xlu1 %2942, %v1671_v38  }
 0x121   : > { %2507 = vmatmul.mubr.msk.bf16.vlgmr.msra.gmra.mrb[0].mxu0 %vm521_vm0, %v3031_v6  ;;  %2543 = vmatmul.mubr.msk.bf16.vlgmr.msra.gmra.mrb[12].mxu1 %vm521_vm0, %v3032_v7  ;;  %v3692_v19 = vpack.c.bf16 %v404_v14, %v403_v18 }
 0x122   : > { %745 = vmatpush1.bf16.msra.mxu0 %v3668_v11  ;;  %1076 = vmatpush1.bf16.msra.mxu1 %v3668_v11 }
 0x123   : > { %681 = vmatprep.mubr.bf16.mxu0 %v3289_v0  ;;  %1012 = vmatprep.mubr.bf16.mxu1 %v3289_v0 }
 0x124   : > { %2520 = vmatprep.subr.msk.bf16.mxu0 %vm3662_vm6, %v3692_v19  ;;  %2556 = vmatprep.subr.msk.bf16.mxu1 %vm3662_vm6, %v3692_v19 }
 0x125   : > { %1710 = vperm.xlu0 %2941, %v1672_v39  }
 0x126   : > { %747 = vmatpush1.bf16.msra.mxu0 %v3696_v20  ;;  %1078 = vmatpush1.bf16.msra.mxu1 %v3696_v20 }
 0x127   : > { %1281 = vmatprep.subr.bf16.mxu0 %v3560_v13  ;;  %v3038_v13 = vld [vmem:[#allocation5 + $0x18] sm:$0xff]  }
 0x129   : > { %2508 = vmatmul.mubr.msk.bf16.gmra.mrb[4].mxu0 %vm521_vm0, %v3033_v21  ;;  %2544 = vmatmul.mubr.msk.bf16.gmra.mrb[16].mxu1 %vm521_vm0, %v3034_v22 }
 0x12a   : > { %691 = vmatprep.mubr.bf16.mxu0 %v3289_v0  ;;  %1022 = vmatprep.mubr.bf16.mxu1 %v3289_v0 }
 0x131   : > { %2509 = vmatmul.mubr.msk.bf16.gmra.mrb[8].mxu0 %vm521_vm0, %v3035_v23  ;;  %2545 = vmatmul.mubr.msk.bf16.gmra.mrb[20].mxu1 %vm521_vm0, %v3036_v24 }
 0x132   : > { %701 = vmatprep.mubr.bf16.mxu0 %v3289_v0  ;;  %1032 = vmatprep.mubr.bf16.mxu1 %v3289_v0 }
 0x139   : > { %2510 = vmatmul.mubr.msk.bf16.gmra.mrb[12].mxu0 %vm521_vm0, %v3037_v25  ;;  %2546 = vmatmul.mubr.msk.bf16.gmra.mrb[24].mxu1 %vm521_vm0, %v3038_v13 }
 0x13a   : > { %776 = vmatprep.mubr.bf16.mxu0 %v3289_v0  ;;  %1107 = vmatprep.mubr.bf16.mxu1 %v3289_v0 }
 0x141   : > { %2521 = vmatmul.mubr.msk.bf16.vlgmr.msra.gmra.mrb[0].mxu0 %vm521_vm0, %v3039_v31  ;;  %2557 = vmatmul.mubr.msk.bf16.vlgmr.msra.gmra.mrb[12].mxu1 %vm521_vm0, %v3040_v33 }
 0x142   : > { %1282 = vmatpush1.bf16.msra.mxu0 %v3557_v8  ;;  %786 = vmatprep.mubr.bf16.mxu0 %v3289_v0  ;;  %v3043_v8 = vld [vmem:[#allocation5 + $0xf0] sm:$0xff]  }
 0x143   : > { %1283 = vmatprep.subr.bf16.mxu0 %v3563_v15  ;;  %1117 = vmatprep.mubr.bf16.mxu1 %v3289_v0  ;;  %v3044_v15 = vld [vmem:[#allocation5 + $0xd0] sm:$0xff]  }
 0x146   : > { %1284 = vmatpush1.bf16.msra.mxu0 %v3567_v16  ;;  %v3045_v16 = vld [vmem:[#allocation5 + $0xf8] sm:$0xff]  }
 0x147   : > { %1386 = vmatprep.subr.bf16.mxu0 %v3621_v46 }
 0x149   : > { %2522 = vmatmul.mubr.msk.bf16.gmra.mrb[4].mxu0 %vm521_vm0, %v3041_v36  ;;  %2558 = vmatmul.mubr.msk.bf16.gmra.mrb[16].mxu1 %vm521_vm0, %v3042_v37 }
 0x14a   : > { %796 = vmatprep.mubr.bf16.mxu0 %v3289_v0  ;;  %1127 = vmatprep.mubr.bf16.mxu1 %v3289_v0 }
 0x151   : > { %2523 = vmatmul.mubr.msk.bf16.gmra.mrb[8].mxu0 %vm521_vm0, %v3043_v8  ;;  %2559 = vmatmul.mubr.msk.bf16.gmra.mrb[20].mxu1 %vm521_vm0, %v3044_v15 }
 0x152   : > { %806 = vmatprep.mubr.bf16.mxu0 %v3289_v0  ;;  %1137 = vmatprep.mubr.bf16.mxu1 %v3289_v0 }
 0x159   : > { %2524 = vmatmul.mubr.msk.bf16.gmra.mrb[12].mxu0 %vm521_vm0, %v3045_v16  ;;  %2560 = vmatmul.mubr.msk.bf16.gmra.mrb[24].mxu1 %vm521_vm0, %v3046_v40 }
 0x15a   : > { %1313 = vmatprep.mubr.bf16.mxu0 %v3289_v0  ;;  %1942 = vmatprep.mubr.bf16.mxu1 %v3289_v0 }
 0x161   : > { %2565 = vmatmul.mubr.msk.bf16.vlgmr.msra.gmra.mrb[16].mxu0 %vm521_vm0, %v3047_v41 }
 0x162   : > { %2575 = vmatpush1.bf16.msk.msra.mxu0 %vm3626_vm4, %v3617_v44  ;;  %1323 = vmatprep.mubr.bf16.mxu0 %v3289_v0  ;;  %v3050_v44 = vld [vmem:[#allocation5 + $0xb8] sm:$0xff]  }
 0x163   : > { %1388 = vmatprep.subr.bf16.mxu0 %v3639_v54  ;;  %v3052_v54 = vld [vmem:[#allocation5 + $0x48] sm:$0xff]  }
 0x166   : > { %2578 = vmatpush1.bf16.msk.msra.mxu0 %vm3626_vm4, %v3655_v62  ;;  %v3055_v62 = vld [vmem:[#allocation5 + $0x100] sm:$0xff]  }
 0x167   : > { %2589 = vmatprep.subr.msk.bf16.mxu0 %vm3662_vm6, %v3666_v5 }
 0x169   : > { %2566 = vmatmul.mubr.msk.bf16.gmra.mrb[20].mxu0 %vm521_vm0, %v3048_v42 }
 0x16a   : > { %1333 = vmatprep.mubr.bf16.mxu0 %v3289_v0 }
 0x171   : > { %2567 = vmatmul.mubr.msk.bf16.gmra.mrb[24].mxu0 %vm521_vm0, %v3049_v43 }
 0x172   : > { %1343 = vmatprep.mubr.bf16.mxu0 %v3289_v0 }
 0x179   : > { %2568 = vmatmul.mubr.msk.bf16.gmra.mrb[28].mxu0 %vm521_vm0, %v3050_v44 }
 0x17a   : > { %1418 = vmatprep.mubr.bf16.mxu0 %v3289_v0  ;;  %v578_v45 = vpop.f32.mrb[0].mxu1 }
 0x17b   : > { %v580_v46 = vpop.f32.mrb[1].mxu1 }
 0x17c   : > { %v582_v48 = vpop.f32.mrb[2].mxu1 }
 0x17d   : > { %v584_v50 = vpop.f32.mrb[3].mxu1 }
 0x181   : > { %2579 = vmatmul.mubr.msk.bf16.vlgmr.msra.gmra.mrb[16].mxu0 %vm521_vm0, %v3051_v49 }
 0x182   : > { %1492 = vmatpush1.bf16.msra.mxu0 %v3668_v11  ;;  %1428 = vmatprep.mubr.bf16.mxu0 %v3289_v0  ;;  %v588_v51 = vpop.f32.mrb[4].mxu1 }
 0x183   : > { %2592 = vmatprep.subr.msk.bf16.mxu0 %vm3662_vm6, %v3692_v19  ;;  %v3765_v52 = vpop.f32.mrb[5].mxu1 }
 0x184   : > { %v3767_v53 = vpop.f32.mrb[6].mxu1 }
 0x185   : > { %v3769_v55 = vpop.f32.mrb[7].mxu1 }
 0x186   : > { %1494 = vmatpush1.bf16.msra.mxu0 %v3696_v20 }
 0x189   : > { %2580 = vmatmul.mubr.msk.bf16.gmra.mrb[20].mxu0 %vm521_vm0, %v3052_v54 }
 0x18a   : > { %1438 = vmatprep.mubr.bf16.mxu0 %v3289_v0  ;;  %v3774_v56 = vpop.f32.mrb[8].mxu1 }
 0x18b   : > { %v3776_v57 = vpop.f32.mrb[9].mxu1 }
 0x18c   : > { %v3778_v58 = vpop.f32.mrb[10].mxu1 }
 0x18d   : > { %v3780_v60 = vpop.f32.mrb[11].mxu1 }
 0x191   : > { %2581 = vmatmul.mubr.msk.bf16.gmra.mrb[24].mxu0 %vm521_vm0, %v3053_v59 }
 0x192   : > { %1448 = vmatprep.mubr.bf16.mxu0 %v3289_v0 }
 0x199   : > { %2582 = vmatmul.mubr.msk.bf16.gmra.mrb[28].mxu0 %vm521_vm0, %v3054_v61 }
 0x19a   : > { %1523 = vmatprep.mubr.bf16.mxu0 %v3289_v0 }
 0x1a1   : > { %2593 = vmatmul.mubr.msk.bf16.vlgmr.msra.gmra.mrb[16].mxu0 %vm521_vm0, %v3055_v62 }
 0x1a2   : > { %1533 = vmatprep.mubr.bf16.mxu0 %v3289_v0 }
 0x1a9   : > { %2594 = vmatmul.mubr.msk.bf16.gmra.mrb[20].mxu0 %vm521_vm0, %v3056_v63 }
 0x1aa   : > { %1543 = vmatprep.mubr.bf16.mxu0 %v3289_v0 }
 0x1b1   : > { %2595 = vmatmul.mubr.msk.bf16.gmra.mrb[24].mxu0 %vm521_vm0, %v3057_v2 }
 0x1b2   : > { %1553 = vmatprep.mubr.bf16.mxu0 %v3289_v0 }
 0x1b9   : > { %2596 = vmatmul.mubr.msk.bf16.gmra.mrb[28].mxu0 %vm521_vm0, %v3058_v3 }
 0x1ba   : > { %2220 = vmatprep.mubr.bf16.mxu0 %v3289_v0 }
 0x214   : > { %v3794_v4 = vpop.f32.mrb[0].mxu0  ;;  %v1109_v5 = vpop.f32.mrb[12].mxu1 }
 0x215   : > { %1164 = vrot.lane.b32.xlu1 %v1109_v5, %s3292_s15  ;;  %v3797_v6 = vpop.f32.mrb[1].mxu0  ;;  %v1111_v7 = vpop.f32.mrb[13].mxu1 }
 0x216   : > { %v3799_v9 = vpop.f32.mrb[2].mxu0  ;;  %v1113_v10 = vpop.f32.mrb[14].mxu1 }
 0x217   : > { %1166 = vrot.lane.b32.xlu0 %v1113_v10, %s3292_s15  ;;  %v3802_v11 = vpop.f32.mrb[3].mxu0  ;;  %v1115_v12 = vpop.f32.mrb[15].mxu1 }
 0x218   : > { %v3867_v10 = vpop.permute.xlu0 %1675 }
 0x219   : > { %1180 = vrot.lane.b32.xlu1 %v1111_v7, %s3292_s15  ;;  %v3865_v7 = vpop.permute.xlu1 %1680 }
 0x21b   : > { %1182 = vrot.lane.b32.xlu0 %v1115_v12, %s3292_s15 }
 0x21c   : > { %v788_v14 = vpop.f32.mrb[4].mxu0  ;;  %v1119_v17 = vpop.f32.mrb[16].mxu1 }
 0x21d   : > { %v3806_v18 = vadd.f32 %v788_v14, %v578_v45  ;;  %1168 = vrot.lane.b32.xlu1 %v1119_v17, %s3292_s15  ;;  %v790_v19 = vpop.f32.mrb[5].mxu0  ;;  %v1121_v20 = vpop.f32.mrb[17].mxu1 }
 0x21e   : > { %v3809_v21 = vadd.f32 %v790_v19, %v580_v46  ;;  %v792_v22 = vpop.f32.mrb[6].mxu0  ;;  %v1123_v23 = vpop.f32.mrb[18].mxu1 }
 0x21f   : > { %v3811_v24 = vadd.f32 %v792_v22, %v582_v48  ;;  %1170 = vrot.lane.b32.xlu0 %v1123_v23, %s3292_s15  ;;  %v794_v25 = vpop.f32.mrb[7].mxu0  ;;  %v1125_v13 = vpop.f32.mrb[19].mxu1 }
 0x220   : > { %v3814_v27 = vadd.f32 %v794_v25, %v584_v50  ;;  %v3869_v12 = vpop.permute.xlu1 %1685  ;;  %v3871_v14 = vpop.permute.xlu0 %1690 }
 0x221   : > { %1184 = vrot.lane.b32.xlu1 %v1121_v20, %s3292_s15 }
 0x223   : > { %1186 = vrot.lane.b32.xlu0 %v1125_v13, %s3292_s15 }
 0x224   : > { %v798_v28 = vpop.f32.mrb[8].mxu0  ;;  %v1129_v29 = vpop.f32.mrb[20].mxu1 }
 0x225   : > { %v3818_v30 = vadd.f32 %v798_v28, %v588_v51  ;;  %1172 = vrot.lane.b32.xlu1 %v1129_v29, %s3292_s15  ;;  %v800_v31 = vpop.f32.mrb[9].mxu0  ;;  %v1131_v33 = vpop.f32.mrb[21].mxu1 }
 0x226   : > { %v3822_v34 = vadd.f32 %v800_v31, %v3765_v52  ;;  %v802_v35 = vpop.f32.mrb[10].mxu0  ;;  %v1133_v36 = vpop.f32.mrb[22].mxu1 }
 0x227   : > { %v3825_v37 = vadd.f32 %v802_v35, %v3767_v53  ;;  %1174 = vrot.lane.b32.xlu0 %v1133_v36, %s3292_s15  ;;  %v804_v38 = vpop.f32.mrb[11].mxu0  ;;  %v1135_v39 = vpop.f32.mrb[23].mxu1 }
 0x228   : > { %v3829_v8 = vadd.f32 %v804_v38, %v3769_v55  ;;  %v3873_v17 = vpop.permute.xlu1 %1695  ;;  %v3875_v19 = vpop.permute.xlu0 %1700 }
 0x229   : > { %1188 = vrot.lane.b32.xlu1 %v1131_v33, %s3292_s15 }
 0x22b   : > { %1190 = vrot.lane.b32.xlu0 %v1135_v39, %s3292_s15 }
 0x22c   : > { %v808_v15 = vpop.f32.mrb[12].mxu0  ;;  %v1139_v16 = vpop.f32.mrb[24].mxu1 }
 0x22d   : > { %v3834_v40 = vadd.f32 %v808_v15, %v3774_v56  ;;  %1176 = vrot.lane.b32.xlu1 %v1139_v16, %s3292_s15  ;;  %v810_v41 = vpop.f32.mrb[13].mxu0  ;;  %v1141_v42 = vpop.f32.mrb[25].mxu1 }
 0x22e   : > { %v3838_v43 = vadd.f32 %v810_v41, %v3776_v57  ;;  %v812_v44 = vpop.f32.mrb[14].mxu0  ;;  %v1143_v45 = vpop.f32.mrb[26].mxu1  ;;  %v307_v41 = vand.u32 15, %v3601_v26 }
 0x22f   : > { %v3841_v46 = vadd.f32 %v812_v44, %v3778_v58  ;;  %1178 = vrot.lane.b32.xlu0 %v1143_v45, %s3292_s15  ;;  %v814_v48 = vpop.f32.mrb[15].mxu0  ;;  %v1145_v49 = vpop.f32.mrb[27].mxu1  ;;  %v314_v44 = vand.u32 15, %v3606_v32 }
 0x230   : > { %v3845_v50 = vadd.f32 %v814_v48, %v3780_v60  ;;  %v3877_v20 = vpop.permute.xlu1 %1705  ;;  %v3879_v22 = vpop.permute.xlu0 %1710  ;;  %vm3888_vm8 = vcmp.ne.s32.totalorder %v307_v41, 0  ;;  %vm3916_vm10 = vcmp.ne.s32.totalorder %v307_v41, 15 }
 0x231   : > { %1192 = vrot.lane.b32.xlu1 %v1141_v42, %s3292_s15  ;;  %vm3896_vm9 = vcmp.ne.s32.totalorder %v314_v44, 0  ;;  %vm3931_vm11 = vcmp.ne.s32.totalorder %v314_v44, 15 }
 0x233   : > { %1194 = vrot.lane.b32.xlu0 %v1145_v49, %s3292_s15 }
 0x274   : > { %v1525_v51 = vpop.f32.mrb[16].mxu0 }
 0x275   : > { %1580 = vrot.lane.b32.xlu1 %v1525_v51, %s3293_s13  ;;  %v1527_v52 = vpop.f32.mrb[17].mxu0 }
 0x276   : > { %v1529_v53 = vpop.f32.mrb[18].mxu0 }
 0x277   : > { %1582 = vrot.lane.b32.xlu0 %v1529_v53, %s3293_s13  ;;  %v1531_v54 = vpop.f32.mrb[19].mxu0 }
 0x279   : > { %1596 = vrot.lane.b32.xlu1 %v1527_v52, %s3293_s13 }
 0x27b   : > { %1598 = vrot.lane.b32.xlu0 %v1531_v54, %s3293_s13 }
 0x27c   : > { %v1535_v55 = vpop.f32.mrb[20].mxu0 }
 0x27d   : > { %1584 = vrot.lane.b32.xlu1 %v1535_v55, %s3293_s13  ;;  %v1537_v56 = vpop.f32.mrb[21].mxu0 }
 0x27e   : > { %v1539_v57 = vpop.f32.mrb[22].mxu0 }
 0x27f   : > { %1586 = vrot.lane.b32.xlu0 %v1539_v57, %s3293_s13  ;;  %v1541_v58 = vpop.f32.mrb[23].mxu0 }
 0x281   : > { %1600 = vrot.lane.b32.xlu1 %v1537_v56, %s3293_s13 }
 0x283   : > { %1602 = vrot.lane.b32.xlu0 %v1541_v58, %s3293_s13 }
 0x284   : > { %v1545_v59 = vpop.f32.mrb[24].mxu0 }
 0x285   : > { %1588 = vrot.lane.b32.xlu1 %v1545_v59, %s3293_s13  ;;  %v1547_v60 = vpop.f32.mrb[25].mxu0 }
 0x286   : > { %v1549_v61 = vpop.f32.mrb[26].mxu0 }
 0x287   : > { %1590 = vrot.lane.b32.xlu0 %v1549_v61, %s3293_s13  ;;  %v1551_v62 = vpop.f32.mrb[27].mxu0  ;;  %v1165_v23 = vpop.permute.xlu1 %1164 }
 0x289   : > { %1604 = vrot.lane.b32.xlu1 %v1547_v60, %s3293_s13  ;;  %v1167_v25 = vpop.permute.xlu0 %1166 }
 0x28b   : > { %1606 = vrot.lane.b32.xlu0 %v1551_v62, %s3293_s13  ;;  %v1181_v13 = vpop.permute.xlu1 %1180 }
 0x28c   : > { %v1555_v63 = vpop.f32.mrb[28].mxu0  ;;  %v1205_v48 = vsel %vm1196_vm7, %v1181_v13, %v1165_v23  ;;  %v1197_v52 = vsel %vm1196_vm7, %v1165_v23, %v1181_v13 }
 0x28d   : > { %1592 = vrot.lane.b32.xlu1 %v1555_v63, %s3293_s13  ;;  %v1557_v2 = vpop.f32.mrb[29].mxu0  ;;  %v1183_v28 = vpop.permute.xlu0 %1182  ;;  %v1217_v57 = vsel %vm3888_vm8, %v1205_v48, 0.0  ;;  %v1218_v58 = vsel %vm3896_vm9, %v1197_v52, 0.0 }
 0x28e   : > { %v1559_v3 = vpop.f32.mrb[30].mxu0  ;;  %v1206_v32 = vsel %vm1196_vm7, %v1183_v28, %v1167_v25  ;;  %v1198_v53 = vsel %vm1196_vm7, %v1167_v25, %v1183_v28  ;;  %v1234_v28 = vadd.f32 %v1218_v58, %v3797_v6 }
 0x28f   : > { %1594 = vrot.lane.b32.xlu0 %v1559_v3, %s3293_s13  ;;  %v1561_v5 = vpop.f32.mrb[31].mxu0  ;;  %v1169_v29 = vpop.permute.xlu1 %1168  ;;  %v1219_v59 = vsel %vm3888_vm8, %v1206_v32, 0.0  ;;  %v1220_v62 = vsel %vm3896_vm9, %v1198_v53, 0.0 }
 0x290   : > { %v1236_v41 = vadd.f32 %v1220_v62, %v3802_v11 }
 0x291   : > { %1608 = vrot.lane.b32.xlu1 %v1557_v2, %s3293_s13  ;;  %v1171_v31 = vpop.permute.xlu0 %1170 }
 0x293   : > { %1610 = vrot.lane.b32.xlu0 %v1561_v5, %s3293_s13  ;;  %v1185_v33 = vpop.permute.xlu1 %1184  ;;  %v1233_v5 = vadd.f32 %v1217_v57, %v3794_v4 }
 0x294   : > { %v1199_v54 = vsel %vm1196_vm7, %v1169_v29, %v1185_v33  ;;  %v1207_v55 = vsel %vm1196_vm7, %v1185_v33, %v1169_v29  ;;  %v1235_v29 = vadd.f32 %v1219_v59, %v3799_v9 }
 0x295   : > { %v1187_v35 = vpop.permute.xlu0 %1186  ;;  %v1221_v63 = vsel %vm3888_vm8, %v1207_v55, 0.0  ;;  %v1222_v2 = vsel %vm3896_vm9, %v1199_v54, 0.0 }
 0x296   : > { %v1208_v3 = vsel %vm1196_vm7, %v1187_v35, %v1171_v31  ;;  %v1200_v23 = vsel %vm1196_vm7, %v1171_v31, %v1187_v35  ;;  %v1237_v31 = vadd.f32 %v3806_v18, %v1221_v63  ;;  %v1238_v35 = vadd.f32 %v3809_v21, %v1222_v2 }
 0x297   : > { %v1173_v36 = vpop.permute.xlu1 %1172  ;;  %v1223_v44 = vsel %vm3888_vm8, %v1208_v3, 0.0  ;;  %v1224_v6 = vsel %vm3896_vm9, %v1200_v23, 0.0 }
 0x298   : > { %v1239_v2 = vadd.f32 %v3811_v24, %v1223_v44  ;;  %v1240_v3 = vadd.f32 %v3814_v27, %v1224_v6 }
 0x299   : > { %v1175_v38 = vpop.permute.xlu0 %1174 }
 0x29b   : > { %v1189_v39 = vpop.permute.xlu1 %1188 }
 0x29c   : > { %v1201_v33 = vsel %vm1196_vm7, %v1173_v36, %v1189_v39  ;;  %v1209_v4 = vsel %vm1196_vm7, %v1189_v39, %v1173_v36 }
 0x29d   : > { %v1191_v15 = vpop.permute.xlu0 %1190  ;;  %v1225_v18 = vsel %vm3888_vm8, %v1209_v4, 0.0  ;;  %v1226_v21 = vsel %vm3896_vm9, %v1201_v33, 0.0 }
 0x29e   : > { %v1210_v9 = vsel %vm1196_vm7, %v1191_v15, %v1175_v38  ;;  %v1202_v58 = vsel %vm1196_vm7, %v1175_v38, %v1191_v15  ;;  %v1242_v38 = vadd.f32 %v3822_v34, %v1226_v21 }
 0x29f   : > { %v3881_v16 = vpop.permute.xlu1 %1176  ;;  %v1227_v59 = vsel %vm3888_vm8, %v1210_v9, 0.0  ;;  %v1228_v4 = vsel %vm3896_vm9, %v1202_v58, 0.0 }
 0x2a1   : > { %v3884_v42 = vpop.permute.xlu0 %1178 }
 0x2a3   : > { %v3894_v49 = vpop.permute.xlu1 %1192 }
 0x2a4   : > { %v3998_v34 = vsel %vm1196_vm7, %v3894_v49, %v3881_v16 }
 0x2a5   : > { %v1195_v56 = vpop.permute.xlu0 %1194 }
 0x2e7   : > { %v1581_v60 = vpop.permute.xlu1 %1580 }
 0x2e9   : > { %v1583_v25 = vpop.permute.xlu0 %1582 }
 0x2eb   : > { %v1597_v48 = vpop.permute.xlu1 %1596 }
 0x2ec   : > { %v1613_v52 = vsel %vm1612_vm12, %v1581_v60, %v1597_v48  ;;  %v1621_v11 = vsel %vm1612_vm12, %v1597_v48, %v1581_v60  ;;  %v3984_v48 = vadd.f32 %v3825_v37, %v1227_v59  ;;  %v4003_v37 = vsel %vm1196_vm7, %v3884_v42, %v1195_v56 }
 0x2ed   : > { %v1633_v36 = vsel %vm3916_vm10, %v1613_v52, 0.0  ;;  %v1634_v39 = vsel %vm3931_vm11, %v1621_v11, 0.0  ;;  %v1599_v32 = vpop.permute.xlu0 %1598 }
 0x2ee   : > { %v1649_v53 = vadd.f32 %v1633_v36, %v1233_v5  ;;  %v1650_v54 = vadd.f32 %v1634_v39, %v1234_v28  ;;  %v1614_v55 = vsel %vm1612_vm12, %v1583_v25, %v1599_v32  ;;  %v1622_v57 = vsel %vm1612_vm12, %v1599_v32, %v1583_v25 }
 0x2ef   : > { %v1635_v60 = vsel %vm3916_vm10, %v1614_v55, 0.0  ;;  %v1636_v62 = vsel %vm3931_vm11, %v1622_v57, 0.0  ;;  %v1585_v63 = vpop.permute.xlu1 %1584  ;;  %v1241_v25 = vadd.f32 %v3818_v30, %v1225_v18  ;;  %v3992_v30 = vsel %vm1196_vm7, %v3881_v16, %v3894_v49 }
 0x2f0   : > { %v1651_v5 = vadd.f32 %v1635_v60, %v1235_v29  ;;  %v1652_v23 = vadd.f32 %v1636_v62, %v1236_v41  ;;  %v1713_v15 = vadd.f32 %v3867_v10, %v1649_v53  ;;  %v1714_v28 = vadd.f32 %v3867_v10, %v1650_v54 }
 0x2f1   : > { %v1587_v33 = vpop.permute.xlu0 %1586  ;;  %v1244_v62 = vadd.f32 %v3829_v8, %v1228_v4  ;;  %v1232_v8 = vsel %vm3896_vm9, %v4003_v37, 0.0 }
 0x2f2   : > { %v1715_v24 = vadd.f32 %v3865_v7, %v1651_v5  ;;  %v1716_v27 = vadd.f32 %v3865_v7, %v1652_v23  ;;  %v4008_v7 = vsel %vm1196_vm7, %v1195_v56, %v3884_v42  ;;  %v1729_v49 = vmax.f32 %v1713_v15, 0.0 }
 0x2f3   : > { %v1601_v10 = vpop.permute.xlu1 %1600  ;;  %v1730_v6 = vmax.f32 %v1714_v28, 0.0 }
 0x2f4   : > { %v1731_v29 = vmax.f32 %v1715_v24, 0.0  ;;  %v1732_v41 = vmax.f32 %v1716_v27, 0.0  ;;  %v1615_v44 = vsel %vm1612_vm12, %v1585_v63, %v1601_v10  ;;  %v1623_v16 = vsel %vm1612_vm12, %v1601_v10, %v1585_v63 }
 0x2f5   : > { %v1637_v9 = vsel %vm3916_vm10, %v1615_v44, 0.0  ;;  %v1638_v52 = vsel %vm3931_vm11, %v1623_v16, 0.0  ;;  %v1603_v11 = vpop.permute.xlu0 %1602  ;;  %v1229_v63 = vsel %vm3888_vm8, %v3998_v34, 0.0 }
 0x2f6   : > { %v1653_v42 = vadd.f32 %v1637_v9, %v1237_v31  ;;  %v1654_v56 = vadd.f32 %v1638_v52, %v1238_v35  ;;  %v1616_v18 = vsel %vm1612_vm12, %v1587_v33, %v1603_v11  ;;  %v1624_v21 = vsel %vm1612_vm12, %v1603_v11, %v1587_v33 }
 0x2f7   : > { %v1639_v36 = vsel %vm3916_vm10, %v1616_v18, 0.0  ;;  %v1640_v39 = vsel %vm3931_vm11, %v1624_v21, 0.0  ;;  %v1589_v32 = vpop.permute.xlu1 %1588  ;;  %v4026_v53 = vpack.c.bf16 %v1732_v41, %v1730_v6  ;;  %v4028_v54 = vpack.i.bf16 %v1731_v29, %v1729_v49 }
 0x2f8   : > { %v1717_v31 = vadd.f32 %v3869_v12, %v1653_v42  ;;  %v1718_v35 = vadd.f32 %v3869_v12, %v1654_v56  ;;  %v1655_v55 = vadd.f32 %v1639_v36, %v1239_v2  ;;  %v1656_v57 = vadd.f32 %v1640_v39, %v1240_v3 }
 0x2f9   : > { %1910 = vmatprep.subr.bf16.mxu1 %v4026_v53  ;;  %2188 = vmatprep.subr.bf16.mxu0 %v4026_v53  ;;  %v4034_v58 = vpack.i.bf16 %v1732_v41, %v1730_v6  ;;  %v4036_v59 = vpack.c.bf16 %v1731_v29, %v1729_v49  ;;  %v1591_v60 = vpop.permute.xlu0 %1590  ;;  %v1230_v2 = vsel %vm3896_vm9, %v3992_v30, 0.0  ;;  %v1231_v3 = vsel %vm3888_vm8, %v4008_v7, 0.0 }
 0x2fa   : > { %v1719_v5 = vadd.f32 %v3871_v14, %v1655_v55  ;;  %v1720_v12 = vadd.f32 %v3871_v14, %v1656_v57  ;;  %2944 = vrot.lane.b32.xlu1 %v4028_v54, %s3290_s24  ;;  %v1733_v4 = vmax.f32 %v1717_v31, 0.0  ;;  %v1734_v24 = vmax.f32 %v1718_v35, 0.0 }
 0x2fb   : > { %2949 = vrot.lane.b32.xlu0 %v4034_v58, %s3290_s24  ;;  %1911 = vmatpush1.bf16.msra.mxu1 %v4036_v59  ;;  %v1605_v14 = vpop.permute.xlu1 %1604  ;;  %v1245_v18 = vadd.f32 %v3834_v40, %v1229_v63  ;;  %v1246_v21 = vadd.f32 %v3838_v43, %v1230_v2  ;;  %v1248_v39 = vadd.f32 %v3845_v50, %v1232_v8 }
 0x2fc   : > { %v1735_v23 = vmax.f32 %v1719_v5, 0.0  ;;  %v1736_v15 = vmax.f32 %v1720_v12, 0.0  ;;  %2189 = vmatpush1.bf16.msra.mxu0 %v4036_v59  ;;  %v1617_v28 = vsel %vm1612_vm12, %v1589_v32, %v1605_v14  ;;  %v1625_v33 = vsel %vm1612_vm12, %v1605_v14, %v1589_v32 }
 0x2fd   : > { %v1641_v27 = vsel %vm3916_vm10, %v1617_v28, 0.0  ;;  %v1642_v30 = vsel %vm3931_vm11, %v1625_v33, 0.0  ;;  %v1607_v34 = vpop.permute.xlu0 %1606 }
 0x2fe   : > { %v1657_v37 = vadd.f32 %v1641_v27, %v1241_v25  ;;  %v1658_v7 = vadd.f32 %v1642_v30, %v1242_v38  ;;  %v1618_v10 = vsel %vm1612_vm12, %v1591_v60, %v1607_v34  ;;  %v1626_v29 = vsel %vm1612_vm12, %v1607_v34, %v1591_v60 }
 0x2ff   : > { %v1643_v41 = vsel %vm3916_vm10, %v1618_v10, 0.0  ;;  %v1644_v44 = vsel %vm3931_vm11, %v1626_v29, 0.0  ;;  %v1593_v16 = vpop.permute.xlu1 %1592  ;;  %v4075_v49 = vpack.c.bf16 %v1736_v15, %v1734_v24  ;;  %v4077_v6 = vpack.i.bf16 %v1735_v23, %v1733_v4 }
 0x300   : > { %v1721_v25 = vadd.f32 %v3873_v17, %v1657_v37  ;;  %v1722_v38 = vadd.f32 %v3873_v17, %v1658_v7  ;;  %v1659_v9 = vadd.f32 %v1643_v41, %v3984_v48  ;;  %v1660_v52 = vadd.f32 %v1644_v44, %v1244_v62  ;;  %v1902_v44 = vld [vmem:[#allocation8 + $0x5] sm:$0x1] }
 0x301   : > { %1912 = vmatprep.subr.bf16.mxu1 %v4075_v49  ;;  %2190 = vmatprep.subr.bf16.mxu0 %v4075_v49  ;;  %v4084_v11 = vpack.i.bf16 %v1736_v15, %v1734_v24  ;;  %v4086_v42 = vpack.c.bf16 %v1735_v23, %v1733_v4  ;;  %v1595_v56 = vpop.permute.xlu0 %1594  ;;  %v1247_v48 = vadd.f32 %v3841_v46, %v1231_v3 }
 0x302   : > { %v1723_v36 = vadd.f32 %v3875_v19, %v1659_v9  ;;  %v1724_v17 = vadd.f32 %v3875_v19, %v1660_v52  ;;  %2954 = vrot.lane.b32.xlu1 %v4077_v6, %s3290_s24  ;;  %v1737_v35 = vmax.f32 %v1721_v25, 0.0  ;;  %v1738_v46 = vmax.f32 %v1722_v38, 0.0 }
 0x303   : > { %2959 = vrot.lane.b32.xlu0 %v4084_v11, %s3290_s24  ;;  %1913 = vmatpush1.bf16.msra.mxu1 %v4086_v42  ;;  %v1609_v32 = vpop.permute.xlu1 %1608 }
 0x304   : > { %v1739_v40 = vmax.f32 %v1723_v36, 0.0  ;;  %v1740_v31 = vmax.f32 %v1724_v17, 0.0  ;;  %2191 = vmatpush1.bf16.msra.mxu0 %v4086_v42  ;;  %v1619_v43 = vsel %vm1612_vm12, %v1593_v16, %v1609_v32  ;;  %v1627_v19 = vsel %vm1612_vm12, %v1609_v32, %v1593_v16 }
 0x305   : > { %v1645_v50 = vsel %vm3916_vm10, %v1619_v43, 0.0  ;;  %v1646_v55 = vsel %vm3931_vm11, %v1627_v19, 0.0  ;;  %v1611_v57 = vpop.permute.xlu0 %1610 }
 0x306   : > { %v1661_v60 = vadd.f32 %v1645_v50, %v1245_v18  ;;  %v1662_v62 = vadd.f32 %v1646_v55, %v1246_v21  ;;  %v1620_v63 = vsel %vm1612_vm12, %v1595_v56, %v1611_v57  ;;  %v1628_v5 = vsel %vm1612_vm12, %v1611_v57, %v1595_v56 }
 0x307   : > { %v1647_v12 = vsel %vm3916_vm10, %v1620_v63, 0.0  ;;  %v1648_v2 = vsel %vm3931_vm11, %v1628_v5, 0.0  ;;  %v4116_v3 = vpack.c.bf16 %v1740_v31, %v1738_v46  ;;  %v2963_v8 = vpack.i.bf16 %v1739_v40, %v1737_v35 }
 0x308   : > { %v1725_v14 = vadd.f32 %v3877_v20, %v1661_v60  ;;  %v1726_v23 = vadd.f32 %v3877_v20, %v1662_v62  ;;  %v1663_v15 = vadd.f32 %v1647_v12, %v1247_v48  ;;  %v1664_v28 = vadd.f32 %v1648_v2, %v1248_v39 }
 0x309   : > { %1914 = vmatprep.subr.bf16.mxu1 %v4116_v3  ;;  %2192 = vmatprep.subr.bf16.mxu0 %v4116_v3  ;;  %v2968_v33 = vpack.i.bf16 %v1740_v31, %v1738_v46  ;;  %v4122_v4 = vpack.c.bf16 %v1739_v40, %v1737_v35 }
 0x30a   : > { %v1727_v24 = vadd.f32 %v3879_v22, %v1663_v15  ;;  %v1728_v27 = vadd.f32 %v3879_v22, %v1664_v28  ;;  %2964 = vrot.lane.b32.xlu1 %v2963_v8, %s3290_s24  ;;  %v1741_v20 = vmax.f32 %v1725_v14, 0.0  ;;  %v1742_v30 = vmax.f32 %v1726_v23, 0.0  ;;  %v1901_v22 = vld [vmem:[#allocation8 + $0x4] sm:$0x1] }
 0x30b   : > { %2969 = vrot.lane.b32.xlu0 %v2968_v33, %s3290_s24  ;;  %1915 = vmatpush1.bf16.msra.mxu1 %v4122_v4 }
 0x30c   : > { %v1743_v34 = vmax.f32 %v1727_v24, 0.0  ;;  %v1744_v37 = vmax.f32 %v1728_v27, 0.0  ;;  %2193 = vmatpush1.bf16.msra.mxu0 %v4122_v4 }
 0x30e   : > { %v2973_v7 = vpack.i.bf16 %v1743_v34, %v1741_v20  ;;  %v2983_v10 = vpack.i.bf16 %v1744_v37, %v1742_v30  ;;  %v4130_v29 = vpack.c.bf16 %v1744_v37, %v1742_v30  ;;  %v4132_v41 = vpack.c.bf16 %v1743_v34, %v1741_v20 }
 0x310   : > { %2974 = vrot.lane.b32.xlu1 %v2973_v7, %s3290_s24  ;;  %2984 = vrot.lane.b32.xlu0 %v2983_v10, %s3290_s24 }
 0x311   : > { %1916 = vmatprep.subr.bf16.mxu1 %v4130_v29  ;;  %2194 = vmatprep.subr.bf16.mxu0 %v4130_v29 }
 0x312   : > { %1917 = vmatpush1.bf16.msra.mxu1 %v4132_v41  ;;  %2195 = vmatpush1.bf16.msra.mxu0 %v4132_v41 }
 0x314   : > { %2979 = vrot.lane.b32.xlu1 %v4028_v54, %s3291_s26  ;;  %2989 = vrot.lane.b32.xlu0 %v4034_v58, %s3291_s26  ;;  %v2329_v54 = vld [vmem:[#allocation10] sm:$0x3] }
 0x315   : > { %2597 = vmatmul.mubr.msk.bf16.vlgmr.msra.gmra.mrb[28].mxu1 %vm1906_vm13, %v1901_v22  ;;  %2651 = vmatmul.mubr.msk.bf16.vlgmr.msra.gmra.mrb[32].mxu0 %vm1906_vm13, %v1902_v44 }
 0x316   : > { %1986 = vmatprep.mubr.bf16.mxu1 %v3289_v0  ;;  %2264 = vmatprep.mubr.bf16.mxu0 %v3289_v0 }
 0x318   : > { %2994 = vrot.lane.b32.xlu1 %v4077_v6, %s3291_s26  ;;  %2999 = vrot.lane.b32.xlu0 %v4084_v11, %s3291_s26 }
 0x31c   : > { %3004 = vrot.lane.b32.xlu1 %v2963_v8, %s3291_s26  ;;  %3009 = vrot.lane.b32.xlu0 %v2968_v33, %s3291_s26 }
 0x320   : > { %3014 = vrot.lane.b32.xlu1 %v2973_v7, %s3291_s26  ;;  %3019 = vrot.lane.b32.xlu0 %v2983_v10, %s3291_s26 }
 0x324   : > { %2332 = vperm.xlu1 %2942, %v2329_v54  }
 0x36c   : > { %v2945_v58 = vpop.permute.xlu1 %2944 }
 0x36d   : > { %v2947_v16 = vunpack.i.h.bf16 %v2945_v58  ;;  %v2946_v25 = vunpack.i.l.bf16 %v2945_v58  ;;  %v2950_v38 = vpop.permute.xlu0 %2949 }
 0x36e   : > { %v2952_v9 = vunpack.i.h.bf16 %v2950_v38  ;;  %v2951_v52 = vunpack.i.l.bf16 %v2950_v38 }
 0x370   : > { %v1786_v6 = vsel %vm359_vm1, %v2952_v9, %v2947_v16  ;;  %v1785_v11 = vsel %vm359_vm1, %v2951_v52, %v2946_v25  ;;  %v1777_v56 = vsel %vm359_vm1, %v2946_v25, %v2951_v52  ;;  %v1778_v18 = vsel %vm359_vm1, %v2947_v16, %v2952_v9 }
 0x371   : > { %v4164_v21 = vpack.c.bf16 %v1786_v6, %v1785_v11  ;;  %v4166_v36 = vpack.c.bf16 %v1778_v18, %v1777_v56 }
 0x373   : > { %1954 = vmatprep.subr.bf16.mxu1 %v4166_v36  ;;  %2232 = vmatprep.subr.bf16.mxu0 %v4166_v36 }
 0x374   : > { %2600 = vmatpush1.bf16.msk.msra.mxu1 %vm3626_vm4, %v4164_v21  ;;  %2654 = vmatpush1.bf16.msk.msra.mxu0 %vm3626_vm4, %v4164_v21  ;;  %v2955_v17 = vpop.permute.xlu1 %2954 }
 0x375   : > { %v2957_v48 = vunpack.i.h.bf16 %v2955_v17  ;;  %v2956_v39 = vunpack.i.l.bf16 %v2955_v17  ;;  %v2960_v32 = vpop.permute.xlu0 %2959  ;;  %v1898_v17 = vld [vmem:[#allocation8 + $0x1] sm:$0x1] }
 0x376   : > { %v2962_v40 = vunpack.i.h.bf16 %v2960_v32  ;;  %v2961_v31 = vunpack.i.l.bf16 %v2960_v32 }
 0x378   : > { %v1788_v43 = vsel %vm359_vm1, %v2962_v40, %v2957_v48  ;;  %v1787_v19 = vsel %vm359_vm1, %v2961_v31, %v2956_v39  ;;  %v1779_v35 = vsel %vm359_vm1, %v2956_v39, %v2961_v31  ;;  %v1780_v46 = vsel %vm359_vm1, %v2957_v48, %v2962_v40 }
 0x379   : > { %v4184_v50 = vpack.c.bf16 %v1788_v43, %v1787_v19  ;;  %v4186_v55 = vpack.c.bf16 %v1780_v46, %v1779_v35  ;;  %v1899_v46 = vld [vmem:[#allocation8 + $0x2] sm:$0x1] }
 0x37b   : > { %1956 = vmatprep.subr.bf16.mxu1 %v4186_v55  ;;  %2234 = vmatprep.subr.bf16.mxu0 %v4186_v55 }
 0x37c   : > { %2603 = vmatpush1.bf16.msk.msra.mxu1 %vm3626_vm4, %v4184_v50  ;;  %2657 = vmatpush1.bf16.msk.msra.mxu0 %vm3626_vm4, %v4184_v50  ;;  %v2965_v57 = vpop.permute.xlu1 %2964 }
 0x37d   : > { %v2967_v60 = vunpack.i.h.bf16 %v2965_v57  ;;  %v2966_v62 = vunpack.i.l.bf16 %v2965_v57  ;;  %v2970_v63 = vpop.permute.xlu0 %2969 }
 0x37e   : > { %v2972_v5 = vunpack.i.h.bf16 %v2970_v63  ;;  %v2971_v12 = vunpack.i.l.bf16 %v2970_v63 }
 0x380   : > { %v1790_v2 = vsel %vm359_vm1, %v2972_v5, %v2967_v60  ;;  %v1789_v8 = vsel %vm359_vm1, %v2971_v12, %v2966_v62  ;;  %v1781_v14 = vsel %vm359_vm1, %v2966_v62, %v2971_v12  ;;  %v1782_v23 = vsel %vm359_vm1, %v2967_v60, %v2972_v5 }
 0x381   : > { %v4204_v15 = vpack.c.bf16 %v1790_v2, %v1789_v8  ;;  %v4206_v28 = vpack.c.bf16 %v1782_v23, %v1781_v14 }
 0x382   : > { %v2975_v33 = vpop.permute.xlu1 %2974  ;;  %v2985_v24 = vpop.permute.xlu0 %2984 }
 0x383   : > { %1958 = vmatprep.subr.bf16.mxu1 %v4206_v28  ;;  %2236 = vmatprep.subr.bf16.mxu0 %v4206_v28  ;;  %v2977_v27 = vunpack.i.h.bf16 %v2975_v33  ;;  %v2976_v20 = vunpack.i.l.bf16 %v2975_v33  ;;  %v2987_v30 = vunpack.i.h.bf16 %v2985_v24  ;;  %v2986_v34 = vunpack.i.l.bf16 %v2985_v24 }
 0x384   : > { %2606 = vmatpush1.bf16.msk.msra.mxu1 %vm3626_vm4, %v4204_v15  ;;  %2660 = vmatpush1.bf16.msk.msra.mxu0 %vm3626_vm4, %v4204_v15 }
 0x385   : > { %v1792_v37 = vsel %vm359_vm1, %v2987_v30, %v2977_v27  ;;  %v1791_v7 = vsel %vm359_vm1, %v2986_v34, %v2976_v20  ;;  %v1783_v10 = vsel %vm359_vm1, %v2976_v20, %v2986_v34  ;;  %v1784_v22 = vsel %vm359_vm1, %v2977_v27, %v2987_v30 }
 0x386   : > { %v4224_v44 = vpack.c.bf16 %v1792_v37, %v1791_v7  ;;  %v2980_v54 = vpop.permute.xlu1 %2979  ;;  %v2990_v58 = vpop.permute.xlu0 %2989  ;;  %v4226_v16 = vpack.c.bf16 %v1784_v22, %v1783_v10 }
 0x387   : > { %v2982_v25 = vunpack.i.h.bf16 %v2980_v54  ;;  %v2981_v38 = vunpack.i.l.bf16 %v2980_v54  ;;  %v2992_v9 = vunpack.i.h.bf16 %v2990_v58  ;;  %v2991_v52 = vunpack.i.l.bf16 %v2990_v58 }
 0x388   : > { %1960 = vmatprep.subr.bf16.mxu1 %v4226_v16  ;;  %2238 = vmatprep.subr.bf16.mxu0 %v4226_v16 }
 0x389   : > { %v1842_v6 = vsel %vm396_vm3, %v2982_v25, %v2992_v9  ;;  %v1850_v11 = vsel %vm396_vm3, %v2992_v9, %v2982_v25  ;;  %v1841_v56 = vsel %vm396_vm3, %v2981_v38, %v2991_v52  ;;  %v1849_v18 = vsel %vm396_vm3, %v2991_v52, %v2981_v38  ;;  %2609 = vmatpush1.bf16.msk.msra.mxu1 %vm3626_vm4, %v4224_v44 }
 0x38a   : > { %v4241_v48 = vpack.c.bf16 %v1842_v6, %v1841_v56  ;;  %v4243_v39 = vpack.c.bf16 %v1850_v11, %v1849_v18  ;;  %2663 = vmatpush1.bf16.msk.msra.mxu0 %vm3626_vm4, %v4224_v44  ;;  %v2995_v32 = vpop.permute.xlu1 %2994  ;;  %v3000_v40 = vpop.permute.xlu0 %2999 }
 0x38b   : > { %v2997_v31 = vunpack.i.h.bf16 %v2995_v32  ;;  %v2996_v43 = vunpack.i.l.bf16 %v2995_v32  ;;  %v3002_v19 = vunpack.i.h.bf16 %v3000_v40  ;;  %v3001_v35 = vunpack.i.l.bf16 %v3000_v40  ;;  %v1905_v32 = vld [vmem:[#allocation8 + $0x8] sm:$0x1] }
 0x38c   : > { %2610 = vmatmul.mubr.msk.bf16.vlgmr.msra.gmra.mrb[32].mxu1 %vm1906_vm13, %v1898_v17  ;;  %2613 = vmatprep.subr.msk.bf16.mxu1 %vm3662_vm6, %v4243_v39  ;;  %v1904_v17 = vld [vmem:[#allocation8 + $0x7] sm:$0x1] }
 0x38d   : > { %v1844_v57 = vsel %vm396_vm3, %v2997_v31, %v3002_v19  ;;  %v1852_v60 = vsel %vm396_vm3, %v3002_v19, %v2997_v31  ;;  %v1843_v62 = vsel %vm396_vm3, %v2996_v43, %v3001_v35  ;;  %v1851_v63 = vsel %vm396_vm3, %v3001_v35, %v2996_v43  ;;  %2667 = vmatprep.subr.msk.bf16.mxu0 %vm3662_vm6, %v4243_v39 }
 0x38e   : > { %v4263_v5 = vpack.c.bf16 %v1844_v57, %v1843_v62  ;;  %v4265_v12 = vpack.c.bf16 %v1852_v60, %v1851_v63  ;;  %1999 = vmatpush1.bf16.msra.mxu1 %v4241_v48  ;;  %2664 = vmatmul.mubr.msk.bf16.vlgmr.msra.gmra.mrb[32].mxu0 %vm1906_vm13, %v1899_v46  ;;  %v3005_v2 = vpop.permute.xlu1 %3004  ;;  %v3010_v8 = vpop.permute.xlu0 %3009 }
 0x38f   : > { %2277 = vmatpush1.bf16.msra.mxu0 %v4241_v48  ;;  %v3007_v14 = vunpack.i.h.bf16 %v3005_v2  ;;  %v3006_v23 = vunpack.i.l.bf16 %v3005_v2  ;;  %v3012_v33 = vunpack.i.h.bf16 %v3010_v8  ;;  %v3011_v24 = vunpack.i.l.bf16 %v3010_v8  ;;  %2030 = vmatprep.mubr.bf16.mxu1 %v3289_v0 }
 0x390   : > { %2616 = vmatprep.subr.msk.bf16.mxu1 %vm3662_vm6, %v4265_v12  ;;  %2670 = vmatprep.subr.msk.bf16.mxu0 %vm3662_vm6, %v4265_v12 }
 0x391   : > { %v1846_v27 = vsel %vm396_vm3, %v3007_v14, %v3012_v33  ;;  %v1854_v20 = vsel %vm396_vm3, %v3012_v33, %v3007_v14  ;;  %v1845_v30 = vsel %vm396_vm3, %v3006_v23, %v3011_v24  ;;  %v1853_v34 = vsel %vm396_vm3, %v3011_v24, %v3006_v23  ;;  %2308 = vmatprep.mubr.bf16.mxu0 %v3289_v0 }
 0x392   : > { %v1893_v37 = vpack.c.bf16 %v1846_v27, %v1845_v30  ;;  %v2618_v7 = vpack.c.bf16 %v1854_v20, %v1853_v34  ;;  %2001 = vmatpush1.bf16.msra.mxu1 %v4263_v5  ;;  %v3015_v10 = vpop.permute.xlu1 %3014  ;;  %v3020_v22 = vpop.permute.xlu0 %3019 }
 0x393   : > { %2279 = vmatpush1.bf16.msra.mxu0 %v4263_v5  ;;  %v3017_v54 = vunpack.i.h.bf16 %v3015_v10  ;;  %v3016_v58 = vunpack.i.l.bf16 %v3015_v10  ;;  %v3022_v25 = vunpack.i.h.bf16 %v3020_v22  ;;  %v3021_v38 = vunpack.i.l.bf16 %v3020_v22 }
 0x394   : > { %2619 = vmatprep.subr.msk.bf16.mxu1 %vm3662_vm6, %v2618_v7  ;;  %2673 = vmatprep.subr.msk.bf16.mxu0 %vm3662_vm6, %v2618_v7 }
 0x395   : > { %v1848_v9 = vsel %vm396_vm3, %v3017_v54, %v3022_v25  ;;  %v1856_v52 = vsel %vm396_vm3, %v3022_v25, %v3017_v54  ;;  %v1847_v6 = vsel %vm396_vm3, %v3016_v58, %v3021_v38  ;;  %v1855_v11 = vsel %vm396_vm3, %v3021_v38, %v3016_v58 }
 0x396   : > { %v1895_v56 = vpack.c.bf16 %v1848_v9, %v1847_v6  ;;  %v2621_v18 = vpack.c.bf16 %v1856_v52, %v1855_v11  ;;  %2003 = vmatpush1.bf16.msra.mxu1 %v1893_v37 }
 0x397   : > { %2281 = vmatpush1.bf16.msra.mxu0 %v1893_v37 }
 0x398   : > { %2622 = vmatprep.subr.msk.bf16.mxu1 %vm3662_vm6, %v2621_v18  ;;  %2676 = vmatprep.subr.msk.bf16.mxu0 %vm3662_vm6, %v2621_v18 }
 0x39a   : > { %2005 = vmatpush1.bf16.msra.mxu1 %v1895_v56 }
 0x39b   : > { %2283 = vmatpush1.bf16.msra.mxu0 %v1895_v56  ;;  %2044 = vmatprep.subr.bf16.mxu1 %v4026_v53  ;;  %v1900_v53 = vld [vmem:[#allocation8 + $0x3] sm:$0x1] }
 0x39d   : > { %2623 = vmatmul.mubr.msk.bf16.vlgmr.msra.gmra.mrb[36].mxu1 %vm1906_vm13, %v1904_v17 }
 0x39e   : > { %2045 = vmatpush1.bf16.msra.mxu1 %v4036_v59  ;;  %2076 = vmatprep.mubr.bf16.mxu1 %v3289_v0  ;;  %v1897_v59 = vld [vmem:[#allocation8] sm:$0x1] }
 0x39f   : > { %2046 = vmatprep.subr.bf16.mxu1 %v4075_v49  ;;  %2677 = vmatmul.mubr.msk.bf16.vlgmr.msra.gmra.mrb[32].mxu0 %vm1906_vm13, %v1905_v32 }
 0x3a2   : > { %2047 = vmatpush1.bf16.msra.mxu1 %v4086_v42 }
 0x3a3   : > { %2048 = vmatprep.subr.bf16.mxu1 %v4116_v3  ;;  %v2333_v57 = vpop.permute.xlu1 %2332 }
 0x3a6   : > { %2049 = vmatpush1.bf16.msra.mxu1 %v4122_v4 }
 0x3a7   : > { %2050 = vmatprep.subr.bf16.mxu1 %v4130_v29 }
 0x3aa   : > { %2051 = vmatpush1.bf16.msra.mxu1 %v4132_v41 }
 0x3ab   : > { %2088 = vmatprep.subr.bf16.mxu1 %v4166_v36 }
 0x3ad   : > { %2624 = vmatmul.mubr.msk.bf16.vlgmr.msra.gmra.mrb[40].mxu1 %vm1906_vm13, %v1900_v53 }
 0x3ae   : > { %2627 = vmatpush1.bf16.msk.msra.mxu1 %vm3626_vm4, %v4164_v21  ;;  %2120 = vmatprep.mubr.bf16.mxu1 %v3289_v0 }
 0x3af   : > { %2090 = vmatprep.subr.bf16.mxu1 %v4186_v55 }
 0x3b2   : > { %2630 = vmatpush1.bf16.msk.msra.mxu1 %vm3626_vm4, %v4184_v50 }
 0x3b3   : > { %2092 = vmatprep.subr.bf16.mxu1 %v4206_v28 }
 0x3b6   : > { %2633 = vmatpush1.bf16.msk.msra.mxu1 %vm3626_vm4, %v4204_v15 }
 0x3b7   : > { %2094 = vmatprep.subr.bf16.mxu1 %v4226_v16 }
 0x3ba   : > { %2636 = vmatpush1.bf16.msk.msra.mxu1 %vm3626_vm4, %v4224_v44 }
 0x3bb   : > { %2640 = vmatprep.subr.msk.bf16.mxu1 %vm3662_vm6, %v4243_v39 }
 0x3bd   : > { %2637 = vmatmul.mubr.msk.bf16.vlgmr.msra.gmra.mrb[40].mxu1 %vm1906_vm13, %v1897_v59 }
 0x3be   : > { %2133 = vmatpush1.bf16.msra.mxu1 %v4241_v48  ;;  %2164 = vmatprep.mubr.bf16.mxu1 %v3289_v0 }
 0x3bf   : > { %2643 = vmatprep.subr.msk.bf16.mxu1 %vm3662_vm6, %v4265_v12 }
 0x3c2   : > { %2135 = vmatpush1.bf16.msra.mxu1 %v4263_v5 }
 0x3c3   : > { %2646 = vmatprep.subr.msk.bf16.mxu1 %vm3662_vm6, %v2618_v7 }
 0x3c6   : > { %2137 = vmatpush1.bf16.msra.mxu1 %v1893_v37 }
 0x3c7   : > { %2649 = vmatprep.subr.msk.bf16.mxu1 %vm3662_vm6, %v2621_v18 }
 0x3ca   : > { %2139 = vmatpush1.bf16.msra.mxu1 %v1895_v56 }
 0x3cd   : > { %2650 = vmatmul.mubr.msk.bf16.vlgmr.msra.gmra.mrb[40].mxu1 %vm1906_vm13, %v1903_v47 }
 0x3e8   : > { %v1944_v49 = vpop.f32.mrb[28].mxu1 }
 0x3e9   : > { %v1946_v42 = vpop.f32.mrb[29].mxu1 }
 0x3ea   : > { %v1948_v0 = vpop.f32.mrb[30].mxu1 }
 0x3eb   : > { %v1949_v3 = vpop.f32.mrb[31].mxu1 }
 0x45f   : > { %v1988_v4 = vpop.f32.mrb[32].mxu1 }
 0x460   : > { %v1989_v29 = vadd.f32 %v1988_v4, %v1944_v49  ;;  %v1990_v41 = vpop.f32.mrb[33].mxu1 }
 0x461   : > { %v1991_v21 = vadd.f32 %v1990_v41, %v1946_v42  ;;  %v1992_v36 = vpop.f32.mrb[34].mxu1 }
 0x462   : > { %v1993_v50 = vpop.f32.mrb[35].mxu1 }
 0x470   : > { %v2032_v55 = vpop.f32.mrb[36].mxu1 }
 0x471   : > { %v2039_v15 = vadd.f32 %v2032_v55, %v1989_v29  ;;  %v2034_v28 = vpop.f32.mrb[37].mxu1 }
 0x472   : > { %v2040_v44 = vadd.f32 %v2034_v28, %v1991_v21  ;;  %v2036_v1 = vpop.f32.mrb[38].mxu1  ;;  %v2310_v16 = vpop.f32.mrb[32].mxu0 }
 0x473   : > { %v2037_v48 = vpop.f32.mrb[39].mxu1  ;;  %v2312_v39 = vpop.f32.mrb[33].mxu0 }
 0x474   : > { %v2314_v40 = vpop.f32.mrb[34].mxu0 }
 0x475   : > { %v2315_v31 = vpop.f32.mrb[35].mxu0 }
 0x4a0   : > { %v2166_v43 = vpop.f32.mrb[40].mxu1 }
 0x4a1   : > { %2175 = vrot.lane.b32.xlu0 %v2166_v43, %s3292_s15  ;;  %v2168_v19 = vpop.f32.mrb[41].mxu1 }
 0x4a2   : > { %2177 = vrot.lane.b32.xlu1 %v2168_v19, %s3292_s15  ;;  %v2170_v35 = vpop.f32.mrb[42].mxu1 }
 0x4a3   : > { %v2171_v46 = vpop.f32.mrb[43].mxu1 }
 0x4a5   : > { %2319 = vrot.lane.b32.xlu0 %v2310_v16, %s3293_s13 }
 0x4a6   : > { %2321 = vrot.lane.b32.xlu1 %v2312_v39, %s3293_s13 }
 0x513   : > { %v2176_v60 = vpop.permute.xlu0 %2175 }
 0x514   : > { %v2178_v62 = vpop.permute.xlu1 %2177 }
 0x515   : > { %v2179_v63 = vsel %vm1196_vm7, %v2176_v60, %v2178_v62  ;;  %v2180_v5 = vsel %vm1196_vm7, %v2178_v62, %v2176_v60 }
 0x516   : > { %v2181_v12 = vsel %vm3888_vm8, %v2180_v5, 0.0  ;;  %v2182_v2 = vsel %vm3896_vm9, %v2179_v63, 0.0 }
 0x517   : > { %v2320_v8 = vpop.permute.xlu0 %2319  ;;  %v2183_v23 = vadd.f32 %v2181_v12, %v2039_v15  ;;  %v2184_v33 = vadd.f32 %v2182_v2, %v2040_v44 }
 0x518   : > { %v2322_v14 = vpop.permute.xlu1 %2321 }
 0x519   : > { %v2323_v24 = vsel %vm1612_vm12, %v2320_v8, %v2322_v14  ;;  %v2324_v27 = vsel %vm1612_vm12, %v2322_v14, %v2320_v8 }
 0x51a   : > { %v2325_v20 = vsel %vm3916_vm10, %v2323_v24, 0.0  ;;  %v2326_v45 = vsel %vm3931_vm11, %v2324_v27, 0.0 }
 0x51b   : > { %v2327_v51 = vadd.f32 %v2325_v20, %v2183_v23  ;;  %v2328_v30 = vadd.f32 %v2326_v45, %v2184_v33 }
 0x51d   : > { %v2335_v34 = vadd.f32 %v2333_v57, %v2327_v51  ;;  %v2336_v37 = vadd.f32 %v2333_v57, %v2328_v30 }
 0x51f   : > { %v2339_v7 = vcombine.low %v2335_v34, %v2336_v37 }
 0x521   : > { %2678 = vst.sshfl [vmem:[%s298_s14] sm:$0x33 pattern:$0x76325410] %v2339_v7 }
 0x522   : > { %3214 = shalt.err (!%p3211_p13)
}
 0x523   : > { %s3215_s29 = scalar_lea.hbm %s4373_s17, 64  ;;  %s3219_s15 = scalar_lea.hbm %s4422_s5, 128 }
 0x524   : > { %p3216_p9 = scmp.ne.s32.totalorder %s4373_s17, %s3215_s29  ;;  %p3220_p11 = scmp.lt.u32.totalorder %s4373_s17, %s4422_s5 }
 0x525   : > { %p3221_p8 = scmp.lt.u32.totalorder %s3219_s15, %s3215_s29  ;;  %p3223_p3 = scmp.lt.u32.totalorder %s3215_s29, %s4373_s17 }
 0x526   : > { %p3217_p0 = pnand %p3216_p9, %p3484_p10 }
 0x527   : > { %p3222_p6 = por %p3221_p8, %p3220_p11 }
 0x528   : > { %p3218_p4 = pneg %p3217_p0 }
 0x529   : > { %p3224_p5 = por %p3223_p3, %p3222_p6 }
 0x52b   : > { %p3225_p7 = pnand %p3224_p5, %p3218_p4 }
 0x52d   : > { %3228 = shalt.err (!%p3225_p7)
}
 0x52e   : > { %2820 = dma.vmem_to_hbm [thread:$0]  (%p3484_p10), %s4375_s8, 64, %s4373_s17, %s2350_s16  }
 0x52f PF: > { %s2376_s30 = sand.u32 1, %s3263_s18   ;;  %p4452_p12 = scmp.ne.s32.totalorder %s4427_s25, 0 }
 0x530   : > { %p4453_p2 = scmp.ge.s32.totalorder %s3275_s21, 2  ;;  %s2377_s14 = scalar_lea.sflag [#allocation4], %s2376_s30 }
 0x532   : > { %p2840_p1 = pnand %p4453_p2, %p4452_p12 }
 0x534   : > { %3258 = dma.done.wait (!%p2840_p1), %s2377_s14, 64  }
 0x535   : > { %3260 = vsyncadd (!%p2840_p1), %s2377_s14, 4294967232  ;;  %p20_p13 = scmp.ge.s32.totalorder %s3474_s12, 4   ;;  %s4454_s18 = smov %s3267_s19 }
 0x536   : > { %s4455_s19 = smov %s3271_s20  ;;  %s4456_s20 = smov %s3490_s27 }
 0x537   : > { %s4457_s21 = smov %s3474_s12  ;;  %22 = sbr.rel (!%p20_p13) target bundleno = 7 (0x7), region = 101 }
 0x53e   :  { %2382 = vsyncpa [#allocation3], 1 }
 0x53f   :  { %2384 = vsyncpa [#allocation3 + $0x1], 1 }
 0x540   :  { %2385 = vsyncpa [#allocation6], 1 }
 0x541   :  { %2386 = vsyncpa [#allocation9], 1 }
 0x542   :  { %2387 = vsyncpa [#allocation4], 1 }
 0x543   :  { %2389 = vsyncpa [#allocation4 + $0x1], 1 }

</bundles_post_ra>
